<compile_context>
chip_gen: v6e
topology: v6e:2x2x1
jax: 0.10.0
libtpu: 0.0.40
codegen_flags: <defaults>
</compile_context>

<pallas_src>
from functools import partial

import numpy as np
import jax
import jax.numpy as jnp
from jax.experimental import pallas as pl

# ----------------------------- model sizes (small) -----------------------------
C_STEM = 8     # x_1 channels   (resnet_list[4] analogue)
C_L1 = 16      # x_2 channels   (resnet_list[3] analogue)
C_L2 = 24      # x_3 channels   (resnet_list[2] analogue)
C_L3 = 32      # x_4 channels   (resnet_list[1] analogue)
C_L4 = 64      # layer4 output  (resnet_list[0] analogue)
C_IN = 32      # in_channels == output_channels
K_BASES = 8    # k
N_JOINTS = 17  # pose_data joints (pose_in_channels = 2 coords per joint)


# ----------------------- fused 3x3 conv kernel (single launch) -------------------
# One launch = whole batch.  The padded input is a flattened (B*rows*wrow, K)
# slab; each tap is a contiguous static slice matmul'd (bf16 on the MXU, f32
# accumulate) against its (K, Cout) weight tap.  Bias + ReLU + optional fused
# Cout=1 "pred" head run in the epilogue while the accumulator is in VMEM.
def _conv_kernel(*refs, taps, m_total, relu, has_pred):
    slab_ref, w_ref, b_ref = refs[0], refs[1], refs[2]
    idx = 3
    if has_pred:
        pw_ref, pb_ref = refs[idx], refs[idx + 1]
        idx += 2
    out_ref = refs[idx]
    if has_pred:
        pred_ref = refs[idx + 1]

    acc = None
    for t, off in enumerate(taps):
        xs = slab_ref[off:off + m_total, :]                      # bf16 slice
        contrib = jnp.dot(xs, w_ref[t], preferred_element_type=jnp.float32)
        acc = contrib if acc is None else acc + contrib
    acc = acc + b_ref[...]                                       # f32 bias
    if relu:
        acc = jnp.maximum(acc, 0.0)
    out_ref[...] = acc.astype(out_ref.dtype)
    if has_pred:
        # fused 1x1 conv with a single output channel: lane-reduce epilogue.
        pred = jnp.sum(acc * pw_ref[...], axis=-1, keepdims=True) + pb_ref[...]
        pred_ref[...] = pred


def conv3x3(x, cp, relu=False, pred=None):
    """3x3 conv, padding=1, NHWC (bf16 activations), fused bias/ReLU and optional
    fused 1-channel 1x1 pred head.  `cp` holds prepacked weights; stride is
    inferred from the tap count (9 -> stride 1, 4 -> stride 2 via space-to-depth).
    Returns cropped (B, Ho, Wo, Cout) bf16 (and (B, Ho, Wo, 1) f32 pred)."""
    B, H, W, Cin = x.shape
    w, b = cp["w"], cp["b"]
    ntap = w.shape[0]
    Cout = w.shape[-1]

    if ntap == 9:                                   # stride 1
        rows, wrow = H + 2, W + 2
        xp = jnp.pad(x, ((0, 0), (1, 1), (1, 1), (0, 0)))
        slab = xp.reshape(B * rows * wrow, Cin)
        taps = tuple(ki * wrow + kj for ki in range(3) for kj in range(3))
        Ho, Wo = H, W
    else:                                           # stride 2 (space-to-depth)
        assert H % 2 == 0 and W % 2 == 0
        rows, wrow = (H + 2) // 2, (W + 2) // 2
        xp = jnp.pad(x, ((0, 0), (1, 1), (1, 1), (0, 0)))
        s2d = xp.reshape(B, rows, 2, wrow, 2, Cin)
        s2d = jnp.transpose(s2d, (0, 1, 3, 2, 4, 5)).reshape(B, rows, wrow, 4 * Cin)
        slab = s2d.reshape(B * rows * wrow, 4 * Cin)
        taps = (0, 1, wrow, wrow + 1)
        Ho, Wo = H // 2, W // 2

    m_total = B * rows * wrow
    # tail rows so every tap slice stays in-bounds (bottom garbage is cropped).
    slab = jnp.pad(slab, ((0, max(taps) + 8), (0, 0)))

    inputs = [slab, w, b]
    out_shapes = [jax.ShapeDtypeStruct((m_total, Cout), jnp.bfloat16)]
    has_pred = pred is not None
    if has_pred:
        inputs += [pred["w"], pred["b"]]
        out_shapes.append(jax.ShapeDtypeStruct((m_total, 1), jnp.float32))

    outs = pl.pallas_call(
        partial(_conv_kernel, taps=taps, m_total=m_total, relu=relu,
                has_pred=has_pred),
        out_shape=tuple(out_shapes) if has_pred else out_shapes[0],
    )(*inputs)

    def unflat(o):
        return o.reshape(B, rows, wrow, o.shape[-1])[:, :Ho, :Wo, :]

    if has_pred:
        return unflat(outs[0]), unflat(outs[1])
    return unflat(outs)


# ----------------------- fused linear / 1x1 conv kernel --------------------------
def _linear_kernel(*refs, relu, has_res):
    a_ref, w_ref, b_ref = refs[0], refs[1], refs[2]
    idx = 3
    if has_res:
        r_ref = refs[idx]
        idx += 1
    o_ref = refs[idx]
    acc = jnp.dot(a_ref[...], w_ref[...], preferred_element_type=jnp.float32)
    acc = acc + b_ref[...]
    if has_res:
        acc = acc + r_ref[...].astype(jnp.float32)
    if relu:
        acc = jnp.maximum(acc, 0.0)
    o_ref[...] = acc.astype(o_ref.dtype)


def pallas_linear(a, w, b, relu=False, residual=None, out_dtype=jnp.bfloat16):
    """(M, K) @ (K, N) + bias [+ residual] (+ReLU), single full-block launch."""
    M = a.shape[0]
    N = w.shape[-1]
    inputs = [a.astype(jnp.bfloat16), w, b]
    if residual is not None:
        inputs.append(residual)
    return pl.pallas_call(
        partial(_linear_kernel, relu=relu, has_res=residual is not None),
        out_shape=jax.ShapeDtypeStruct((M, N), out_dtype),
    )(*inputs)


# ----------------------- Pallas EM-attention kernel (MPT) ------------------------
def _em_kernel(x_ref, mu_ref, wout_ref, bout_ref, y_ref, mu_out_ref, *, iters, batch):
    for bi in range(batch):                      # tiny static batch, single launch
        x = x_ref[bi]                            # (L, c) f32
        xT = x.T                                 # resident transpose, reused per iter
        mu0 = mu_ref[bi]                         # (c, k)

        def step(_, mu):
            att = jnp.dot(x, mu, preferred_element_type=jnp.float32)      # (L, k)
            att = jax.nn.softmax(att, axis=-1)
            mu_n = jnp.dot(xT, att, preferred_element_type=jnp.float32)   # (c, k)
            mu_n = mu_n / (jnp.sum(att, axis=0, keepdims=True) + 1e-6)
            mu_n = mu_n * jax.lax.rsqrt(
                jnp.sum(mu_n * mu_n, axis=0, keepdims=True) + 1e-6)
            return mu_n

        mu = jax.lax.fori_loop(0, iters, step, mu0)
        att = jax.nn.softmax(jnp.dot(x, mu, preferred_element_type=jnp.float32),
                             axis=-1)                                      # (L, k)
        recon = jnp.dot(att, mu.T, preferred_element_type=jnp.float32)     # (L, c)
        # fused MPT output 1x1 conv + residual + ReLU epilogue
        y = jnp.dot(recon.astype(jnp.bfloat16), wout_ref[...],
                    preferred_element_type=jnp.float32) + bout_ref[...]
        y_ref[bi] = jnp.maximum(x + y, 0.0).astype(y_ref.dtype)
        mu_out_ref[bi] = mu


def em_attention_fused(x_blc, mu_init, out_w, out_b, iters=3):
    """x_blc: (b, L, c), mu_init: (b, c, k) -> (relu(x + recon@W + b), mu)."""
    b, L, c = x_blc.shape
    k = mu_init.shape[-1]
    return pl.pallas_call(
        partial(_em_kernel, iters=iters, batch=b),
        out_shape=(jax.ShapeDtypeStruct((b, L, c), jnp.bfloat16),
                   jax.ShapeDtypeStruct((b, c, k), jnp.float32)),
    )(x_blc.astype(jnp.float32), mu_init.astype(jnp.float32), out_w, out_b)


# ----------------------------- resize / pooling glue -----------------------------
def _interp_matrix_np(out_size, in_size):
    m = np.zeros((out_size, in_size), np.float32)
    if in_size == 1 or out_size == 1:
        m[:, 0] = 1.0
        return m
    pos = np.linspace(0.0, in_size - 1.0, out_size)
    lo = np.minimum(np.floor(pos).astype(np.int64), in_size - 1)
    hi = np.minimum(lo + 1, in_size - 1)
    frac = (pos - lo).astype(np.float32)
    for r in range(out_size):
        m[r, lo[r]] += 1.0 - frac[r]
        m[r, hi[r]] += frac[r]
    return m


# TODO(synk): bilinear resize (align_corners=True) stays as separable-matmul XLA
#             glue (constant-folded under jit), not a dedicated Pallas kernel.
def resize_bilinear_ac(x, oh, ow):
    B, H, W, C = x.shape
    if oh == H and ow == W:
        return x
    my = jnp.asarray(_interp_matrix_np(oh, H))
    mx = jnp.asarray(_interp_matrix_np(ow, W))
    y = jnp.einsum('oh,bhwc->bowc', my, x)
    return jnp.einsum('pw,bowc->bopc', mx, y)


def maxpool2(x):
    B, H, W, C = x.shape
    return x.reshape(B, H // 2, 2, W // 2, 2, C).max(axis=(2, 4))


# ----------------------------- sub-modules --------------------------------------
def extractor(params, x):
    """Synthetic ResNet-style pyramid: returns (x_1, x_2, x_3, x_4, layer4_out)."""
    x = conv3x3(x, params["stem"], relu=True)     # conv1 + bn1 + relu (stride 2)
    x_1 = maxpool2(x)                             # maxpool -> x_1
    x_2 = conv3x3(x_1, params["layer1"], relu=True)
    x_3 = conv3x3(x_2, params["layer2"], relu=True)
    x_4 = conv3x3(x_3, params["layer3"], relu=True)
    x_5 = conv3x3(x_4, params["layer4"], relu=True)
    return x_1, x_2, x_3, x_4, x_5


def apl_module(p, ref_feat, obj_m, per_m, pose):
    """Purpose encoding from ref features + object/person masks + pose."""
    eps = 1e-6
    rf = ref_feat.astype(jnp.float32)
    obj_vec = (rf * obj_m).sum((1, 2)) / (obj_m.sum((1, 2)) + eps)     # (b, c)
    per_vec = (rf * per_m).sum((1, 2)) / (per_m.sum((1, 2)) + eps)     # (b, c)
    b, h, w, c = ref_feat.shape
    pose_vec = pallas_linear(pose.reshape(b, -1), p["pose_w"], p["pose_b"],
                             relu=True, out_dtype=jnp.float32)
    g = obj_vec + per_vec + pose_vec                                    # (b, c)
    g_full = jnp.broadcast_to(g[:, None, :], (b, h * w, c)).reshape(b * h * w, c)
    # 1x1 proj conv with the broadcast "purpose" add + ReLU fused in-kernel.
    purpose = pallas_linear(ref_feat.reshape(b * h * w, c),
                            p["proj_w"], p["proj_b"],
                            relu=True, residual=g_full, out_dtype=jnp.float32)
    return purpose.reshape(b, h, w, c)


def mpt_module(p, purpose, x5, n, iters=3):
    """EM attention over the n-frame feature set; returns (x_5, mu)."""
    b = purpose.shape[0]
    Bn, h, w, c = x5.shape
    pv = purpose.mean(axis=(1, 2))                    # (b, c)
    mu0 = p["mu"][None, :, :] + pv[:, :, None]        # (b, c, k)
    x_blc = x5.reshape(b, n * h * w, c)               # (b, L, c), no transpose
    y, mu = em_attention_fused(x_blc, mu0, p["out_w"], p["out_b"], iters=iters)
    return y.reshape(Bn, h, w, c), mu


def dce_module(p, x):
    """x: (b, n, h, w, c) -> cross-frame context fusion."""
    b, n, h, w, c = x.shape
    m = x.mean(axis=1)
    g = pallas_linear(m.reshape(b * h * w, c), p["w"], p["b"], relu=True,
                      out_dtype=jnp.float32)
    g = g.reshape(b, 1, h, w, c)
    return (x.astype(jnp.float32) + g).astype(jnp.bfloat16)


def decoder(p, tmp, skip):
    B, hs, ws, _ = skip.shape
    tmp_up = resize_bilinear_ac(tmp, hs, ws)
    s = conv3x3(skip, p["skip"], relu=True)
    u = (s.astype(jnp.float32) + tmp_up).astype(jnp.bfloat16)
    # fuse conv + fused 1-channel pred head in a single kernel
    return conv3x3(u, p["fuse"], relu=True, pred=p["pred"])


# ----------------------------- parameters (prepacked once) -----------------------
def _prep_conv3x3(w, b, stride):
    """Pack (3,3,Cin,Cout) weights: stride 1 -> 9 taps of (Cin,Cout); stride 2 ->
    4 space-to-depth block taps of (4*Cin, Cout).  Cast to bf16 once, here."""
    kh, kw, cin, cout = w.shape
    if stride == 1:
        wp = w.reshape(9, cin, cout)
    else:
        wp = jnp.zeros((4, 4 * cin, cout), jnp.float32)
        for ki in range(3):
            for kj in range(3):
                t = (ki // 2) * 2 + (kj // 2)          # which s2d block tap
                g = (ki % 2) * 2 + (kj % 2)            # which channel group
                wp = wp.at[t, g * cin:(g + 1) * cin, :].set(w[ki, kj])
    return {"w": wp.astype(jnp.bfloat16),
            "b": b.reshape(1, cout).astype(jnp.float32)}


def _prep_pred(w, b):
    c = w.shape[-2]
    return {"w": w.reshape(1, c).astype(jnp.float32),
            "b": b.reshape(1, 1).astype(jnp.float32)}


def _conv_p(key, kh, kw, cin, cout, scale=0.05):
    k1, k2 = jax.random.split(key)
    w = jax.random.normal(k1, (kh, kw, cin, cout), jnp.float32) * scale
    b = jax.random.normal(k2, (cout,), jnp.float32) * scale
    return w, b


def init_params(key):
    ks = jax.random.split(key, 32)
    p = {
        "stem": _prep_conv3x3(*_conv_p(ks[0], 3, 3, 3, C_STEM), stride=2),
        "layer1": _prep_conv3x3(*_conv_p(ks[1], 3, 3, C_STEM, C_L1), stride=1),
        "layer2": _prep_conv3x3(*_conv_p(ks[2], 3, 3, C_L1, C_L2), stride=2),
        "layer3": _prep_conv3x3(*_conv_p(ks[3], 3, 3, C_L2, C_L3), stride=2),
        "layer4": _prep_conv3x3(*_conv_p(ks[4], 3, 3, C_L3, C_L4), stride=2),
        "conv_1": _prep_conv3x3(*_conv_p(ks[5], 3, 3, C_L4, C_IN), stride=1),
        "conv_2": _prep_conv3x3(*_conv_p(ks[6], 3, 3, C_L4, C_IN), stride=1),
    }
    pw, pb = _conv_p(ks[7], 1, 1, C_IN, C_IN)
    p["apl"] = {
        "pose_w": (jax.random.normal(ks[8], (N_JOINTS * 2, C_IN), jnp.float32)
                   * 0.05).astype(jnp.bfloat16),
        "pose_b": (jax.random.normal(ks[9], (C_IN,), jnp.float32)
                   * 0.05).reshape(1, C_IN),
        "proj_w": pw.reshape(C_IN, C_IN).astype(jnp.bfloat16),
        "proj_b": pb.reshape(1, C_IN),
    }
    ow, ob = _conv_p(ks[10], 1, 1, C_IN, C_IN)
    p["mpt"] = {
        "mu": jax.random.normal(ks[11], (C_IN, K_BASES), jnp.float32) * 0.05,
        "out_w": ow.reshape(C_IN, C_IN).astype(jnp.bfloat16),
        "out_b": ob.reshape(1, C_IN),
    }
    dw, db = _conv_p(ks[12], 1, 1, C_IN, C_IN)
    p["dce"] = {"w": dw.reshape(C_IN, C_IN).astype(jnp.bfloat16),
                "b": db.reshape(1, C_IN)}
    p["dec_5"] = _prep_conv3x3(*_conv_p(ks[13], 3, 3, C_IN, C_IN), stride=1)
    p["dec_5_2"] = _prep_pred(*_conv_p(ks[14], 1, 1, C_IN, 1))

    def dec_params(k, cin):
        k1, k2, k3 = jax.random.split(k, 3)
        return {"skip": _prep_conv3x3(*_conv_p(k1, 3, 3, cin, C_IN), stride=1),
                "fuse": _prep_conv3x3(*_conv_p(k2, 3, 3, C_IN, C_IN), stride=1),
                "pred": _prep_pred(*_conv_p(k3, 1, 1, C_IN, 1))}

    p["decoder_4"] = dec_params(ks[15], C_L3)
    p["decoder_3"] = dec_params(ks[16], C_L2)
    p["decoder_2"] = dec_params(ks[17], C_L1)
    p["decoder_1"] = dec_params(ks[18], C_STEM)
    return p


# ----------------------------- OS_AD forward ------------------------------------
def os_ad_forward(params, img, ref, obj_mask, per_mask, pose_data, size=None):
    b, n, img_c, h, w = img.shape
    imgs = jnp.transpose(img.reshape(b * n, img_c, h, w),
                         (0, 2, 3, 1)).astype(jnp.bfloat16)             # NHWC bf16

    x_1, x_2, x_3, x_4, l4 = extractor(params, imgs)
    x_5 = conv3x3(l4, params["conv_1"], relu=False)

    refs = jnp.transpose(ref, (0, 2, 3, 1)).astype(jnp.bfloat16)
    _, _, _, _, r5 = extractor(params, refs)
    ref_feat = conv3x3(r5, params["conv_2"], relu=False)
    r_h, r_w = ref_feat.shape[1], ref_feat.shape[2]

    obj_h, obj_w = obj_mask.shape[-2:]
    obj_m = resize_bilinear_ac(obj_mask.reshape(b, obj_h, obj_w, 1), r_h, r_w)
    per_m = resize_bilinear_ac(per_mask.reshape(b, obj_h, obj_w, 1), r_h, r_w)

    purpose = apl_module(params["apl"], ref_feat, obj_m, per_m, pose_data)
    x_5, mu = mpt_module(params["mpt"], purpose, x_5, n)

    h5, w5, c5 = x_5.shape[1], x_5.shape[2], x_5.shape[3]
    x_5 = dce_module(params["dce"],
                     x_5.reshape(b, n, h5, w5, c5)).reshape(b * n, h5, w5, c5)

    # ConvBNReLU (+Dropout2d eval = identity) with the 1-channel pred head fused.
    tmp_x_5, p5 = conv3x3(x_5, params["dec_5"], relu=True, pred=params["dec_5_2"])

    tmp_x_4, p4 = decoder(params["decoder_4"], tmp_x_5, x_4)
    tmp_x_3, p3 = decoder(params["decoder_3"], tmp_x_4, x_3)
    tmp_x_2, p2 = decoder(params["decoder_2"], tmp_x_3, x_2)
    _tmp_x_1, p1 = decoder(params["decoder_1"], tmp_x_2, x_1)

    if size is None:
        size = (h, w)
    preds = []
    for pr in (p5, p4, p3, p2, p1):
        up = resize_bilinear_ac(pr, size[0], size[1])            # (b*n, H, W, 1)
        up = jnp.transpose(up, (0, 3, 1, 2)).reshape(b, n, -1, size[0], size[1])
        preds.append(up)
    return preds, mu


# ----------------------------- self-test vs lax.conv ------------------------------
def _conv_self_test():
    kx, kw, kb = jax.random.split(jax.random.PRNGKey(7), 3)
    x = jax.random.normal(kx, (2, 8, 8, 5), jnp.float32)
    w = jax.random.normal(kw, (3, 3, 5, 7), jnp.float32) * 0.1
    b = jax.random.normal(kb, (7,), jnp.float32) * 0.1
    for stride in (1, 2):
        cp = _prep_conv3x3(w, b, stride)
        out = conv3x3(x.astype(jnp.bfloat16), cp, relu=False).astype(jnp.float32)
        refo = jax.lax.conv_general_dilated(
            x, w, window_strides=(stride, stride), padding=((1, 1), (1, 1)),
            dimension_numbers=("NHWC", "HWIO", "NHWC")) + b
        err = float(jnp.max(jnp.abs(out - refo)))
        assert err < 0.08, f"conv3x3 self-test failed (stride={stride}, err={err})"


# ----------------------------- main ----------------------------------------------
if __name__ == "__main__":
    _conv_self_test()   # validates the packed-tap / space-to-depth conv kernel

    key = jax.random.PRNGKey(0)
    kp, ki, kr, ko, kq, kd = jax.random.split(key, 6)
    params = init_params(kp)

    b, n, H, W = 2, 2, 64, 64
    img = jax.random.normal(ki, (b, n, 3, H, W), jnp.float32)
    ref = jax.random.normal(kr, (b, 3, H, W), jnp.float32)
    obj_mask = (jax.random.uniform(ko, (b, H, W)) > 0.5).astype(jnp.float32)
    per_mask = (jax.random.uniform(kq, (b, H, W)) > 0.5).astype(jnp.float32)
    pose_data = jax.random.normal(kd, (b, N_JOINTS, 2), jnp.float32)

    fwd = jax.jit(os_ad_forward)
    preds, mu = fwd(params, img, ref, obj_mask, per_mask, pose_data)
    preds = jax.block_until_ready(preds)
    mu = jax.block_until_ready(mu)

    assert len(preds) == 5
    for pr in preds:
        assert pr.shape == (b, n, 1, H, W)
        assert bool(jnp.all(jnp.isfinite(pr)))
    assert mu.shape == (b, C_IN, K_BASES)
    print("KERNEL_OK")
</pallas_src>

<mosaic_0001>
module attributes {stable_mosaic.version = 11 : i64} {
  func.func @_conv_kernel(%arg0: memref<230x5xbf16, #tpu.memory_space<vmem>>, %arg1: memref<9x5x7xbf16, #tpu.memory_space<vmem>>, %arg2: memref<1x7xf32, #tpu.memory_space<vmem>>, %arg3: memref<200x7xbf16, #tpu.memory_space<vmem>>) attributes {dimension_semantics = [], scalar_prefetch = 0 : i64, scratch_operands = 0 : i64, tpu.core_type = #tpu.core_type<tc>} {
    %c0 = arith.constant 0 : index
    %c0_0 = arith.constant 0 : index
    %0 = vector.load %arg0[%c0, %c0_0] : memref<230x5xbf16, #tpu.memory_space<vmem>>, vector<200x5xbf16>
    %c0_1 = arith.constant 0 : index
    %c0_2 = arith.constant 0 : index
    %c0_3 = arith.constant 0 : index
    %1 = vector.load %arg1[%c0_1, %c0_2, %c0_3] : memref<9x5x7xbf16, #tpu.memory_space<vmem>>, vector<1x5x7xbf16>
    %2 = vector.shape_cast %1 : vector<1x5x7xbf16> to vector<5x7xbf16>
    %cst = arith.constant dense<0.000000e+00> : vector<200x7xf32>
    %3 = tpu.matmul %0, %2, %cst {dimension_numbers = #tpu.dot_dimension_numbers<[1], [0], [0], [1], [0, 0, 1, 1], [], []>} : vector<200x5xbf16>, vector<5x7xbf16>, vector<200x7xf32> -> vector<200x7xf32>
    %c1 = arith.constant 1 : index
    %c0_4 = arith.constant 0 : index
    %4 = vector.load %arg0[%c1, %c0_4] : memref<230x5xbf16, #tpu.memory_space<vmem>>, vector<200x5xbf16>
    %c1_5 = arith.constant 1 : index
    %c0_6 = arith.constant 0 : index
    %c0_7 = arith.constant 0 : index
    %5 = vector.load %arg1[%c1_5, %c0_6, %c0_7] : memref<9x5x7xbf16, #tpu.memory_space<vmem>>, vector<1x5x7xbf16>
    %6 = vector.shape_cast %5 : vector<1x5x7xbf16> to vector<5x7xbf16>
    %cst_8 = arith.constant dense<0.000000e+00> : vector<200x7xf32>
    %7 = tpu.matmul %4, %6, %cst_8 {dimension_numbers = #tpu.dot_dimension_numbers<[1], [0], [0], [1], [0, 0, 1, 1], [], []>} : vector<200x5xbf16>, vector<5x7xbf16>, vector<200x7xf32> -> vector<200x7xf32>
    %8 = arith.addf %3, %7 : vector<200x7xf32>
    %c2 = arith.constant 2 : index
    %c0_9 = arith.constant 0 : index
    %9 = vector.load %arg0[%c2, %c0_9] : memref<230x5xbf16, #tpu.memory_space<vmem>>, vector<200x5xbf16>
    %c2_10 = arith.constant 2 : index
    %c0_11 = arith.constant 0 : index
    %c0_12 = arith.constant 0 : index
    %10 = vector.load %arg1[%c2_10, %c0_11, %c0_12] : memref<9x5x7xbf16, #tpu.memory_space<vmem>>, vector<1x5x7xbf16>
    %11 = vector.shape_cast %10 : vector<1x5x7xbf16> to vector<5x7xbf16>
    %cst_13 = arith.constant dense<0.000000e+00> : vector<200x7xf32>
    %12 = tpu.matmul %9, %11, %cst_13 {dimension_numbers = #tpu.dot_dimension_numbers<[1], [0], [0], [1], [0, 0, 1, 1], [], []>} : vector<200x5xbf16>, vector<5x7xbf16>, vector<200x7xf32> -> vector<200x7xf32>
    %13 = arith.addf %8, %12 : vector<200x7xf32>
    %c10 = arith.constant 10 : index
    %c0_14 = arith.constant 0 : index
    %14 = vector.load %arg0[%c10, %c0_14] : memref<230x5xbf16, #tpu.memory_space<vmem>>, vector<200x5xbf16>
    %c3 = arith.constant 3 : index
    %c0_15 = arith.constant 0 : index
    %c0_16 = arith.constant 0 : index
    %15 = vector.load %arg1[%c3, %c0_15, %c0_16] : memref<9x5x7xbf16, #tpu.memory_space<vmem>>, vector<1x5x7xbf16>
    %16 = vector.shape_cast %15 : vector<1x5x7xbf16> to vector<5x7xbf16>
    %cst_17 = arith.constant dense<0.000000e+00> : vector<200x7xf32>
    %17 = tpu.matmul %14, %16, %cst_17 {dimension_numbers = #tpu.dot_dimension_numbers<[1], [0], [0], [1], [0, 0, 1, 1], [], []>} : vector<200x5xbf16>, vector<5x7xbf16>, vector<200x7xf32> -> vector<200x7xf32>
    %18 = arith.addf %13, %17 : vector<200x7xf32>
    %c11 = arith.constant 11 : index
    %c0_18 = arith.constant 0 : index
    %19 = vector.load %arg0[%c11, %c0_18] : memref<230x5xbf16, #tpu.memory_space<vmem>>, vector<200x5xbf16>
    %c4 = arith.constant 4 : index
    %c0_19 = arith.constant 0 : index
    %c0_20 = arith.constant 0 : index
    %20 = vector.load %arg1[%c4, %c0_19, %c0_20] : memref<9x5x7xbf16, #tpu.memory_space<vmem>>, vector<1x5x7xbf16>
    %21 = vector.shape_cast %20 : vector<1x5x7xbf16> to vector<5x7xbf16>
    %cst_21 = arith.constant dense<0.000000e+00> : vector<200x7xf32>
    %22 = tpu.matmul %19, %21, %cst_21 {dimension_numbers = #tpu.dot_dimension_numbers<[1], [0], [0], [1], [0, 0, 1, 1], [], []>} : vector<200x5xbf16>, vector<5x7xbf16>, vector<200x7xf32> -> vector<200x7xf32>
    %23 = arith.addf %18, %22 : vector<200x7xf32>
    %c12 = arith.constant 12 : index
    %c0_22 = arith.constant 0 : index
    %24 = vector.load %arg0[%c12, %c0_22] : memref<230x5xbf16, #tpu.memory_space<vmem>>, vector<200x5xbf16>
    %c5 = arith.constant 5 : index
    %c0_23 = arith.constant 0 : index
    %c0_24 = arith.constant 0 : index
    %25 = vector.load %arg1[%c5, %c0_23, %c0_24] : memref<9x5x7xbf16, #tpu.memory_space<vmem>>, vector<1x5x7xbf16>
    %26 = vector.shape_cast %25 : vector<1x5x7xbf16> to vector<5x7xbf16>
    %cst_25 = arith.constant dense<0.000000e+00> : vector<200x7xf32>
    %27 = tpu.matmul %24, %26, %cst_25 {dimension_numbers = #tpu.dot_dimension_numbers<[1], [0], [0], [1], [0, 0, 1, 1], [], []>} : vector<200x5xbf16>, vector<5x7xbf16>, vector<200x7xf32> -> vector<200x7xf32>
    %28 = arith.addf %23, %27 : vector<200x7xf32>
    %c20 = arith.constant 20 : index
    %c0_26 = arith.constant 0 : index
    %29 = vector.load %arg0[%c20, %c0_26] : memref<230x5xbf16, #tpu.memory_space<vmem>>, vector<200x5xbf16>
    %c6 = arith.constant 6 : index
    %c0_27 = arith.constant 0 : index
    %c0_28 = arith.constant 0 : index
    %30 = vector.load %arg1[%c6, %c0_27, %c0_28] : memref<9x5x7xbf16, #tpu.memory_space<vmem>>, vector<1x5x7xbf16>
    %31 = vector.shape_cast %30 : vector<1x5x7xbf16> to vector<5x7xbf16>
    %cst_29 = arith.constant dense<0.000000e+00> : vector<200x7xf32>
    %32 = tpu.matmul %29, %31, %cst_29 {dimension_numbers = #tpu.dot_dimension_numbers<[1], [0], [0], [1], [0, 0, 1, 1], [], []>} : vector<200x5xbf16>, vector<5x7xbf16>, vector<200x7xf32> -> vector<200x7xf32>
    %33 = arith.addf %28, %32 : vector<200x7xf32>
    %c21 = arith.constant 21 : index
    %c0_30 = arith.constant 0 : index
    %34 = vector.load %arg0[%c21, %c0_30] : memref<230x5xbf16, #tpu.memory_space<vmem>>, vector<200x5xbf16>
    %c7 = arith.constant 7 : index
    %c0_31 = arith.constant 0 : index
    %c0_32 = arith.constant 0 : index
    %35 = vector.load %arg1[%c7, %c0_31, %c0_32] : memref<9x5x7xbf16, #tpu.memory_space<vmem>>, vector<1x5x7xbf16>
    %36 = vector.shape_cast %35 : vector<1x5x7xbf16> to vector<5x7xbf16>
    %cst_33 = arith.constant dense<0.000000e+00> : vector<200x7xf32>
    %37 = tpu.matmul %34, %36, %cst_33 {dimension_numbers = #tpu.dot_dimension_numbers<[1], [0], [0], [1], [0, 0, 1, 1], [], []>} : vector<200x5xbf16>, vector<5x7xbf16>, vector<200x7xf32> -> vector<200x7xf32>
    %38 = arith.addf %33, %37 : vector<200x7xf32>
    %c22 = arith.constant 22 : index
    %c0_34 = arith.constant 0 : index
    %39 = vector.load %arg0[%c22, %c0_34] : memref<230x5xbf16, #tpu.memory_space<vmem>>, vector<200x5xbf16>
    %c8 = arith.constant 8 : index
    %c0_35 = arith.constant 0 : index
    %c0_36 = arith.constant 0 : index
    %40 = vector.load %arg1[%c8, %c0_35, %c0_36] : memref<9x5x7xbf16, #tpu.memory_space<vmem>>, vector<1x5x7xbf16>
    %41 = vector.shape_cast %40 : vector<1x5x7xbf16> to vector<5x7xbf16>
    %cst_37 = arith.constant dense<0.000000e+00> : vector<200x7xf32>
    %42 = tpu.matmul %39, %41, %cst_37 {dimension_numbers = #tpu.dot_dimension_numbers<[1], [0], [0], [1], [0, 0, 1, 1], [], []>} : vector<200x5xbf16>, vector<5x7xbf16>, vector<200x7xf32> -> vector<200x7xf32>
    %43 = arith.addf %38, %42 : vector<200x7xf32>
    %c0_38 = arith.constant 0 : index
    %c0_39 = arith.constant 0 : index
    %44 = vector.load %arg2[%c0_38, %c0_39] : memref<1x7xf32, #tpu.memory_space<vmem>>, vector<1x7xf32>
    %45 = vector.broadcast %44 : vector<1x7xf32> to vector<200x7xf32>
    %46 = arith.addf %43, %45 : vector<200x7xf32>
    %47 = arith.truncf %46 : vector<200x7xf32> to vector<200x7xbf16>
    %c0_40 = arith.constant 0 : index
    %c0_41 = arith.constant 0 : index
    %48 = vector.load %arg3[%c0_40, %c0_41] : memref<200x7xbf16, #tpu.memory_space<vmem>>, vector<200x7xbf16>
    tpu.vector_store %arg3[%c0_40, %c0_41], %47 {strides = array<i32>} : memref<200x7xbf16, #tpu.memory_space<vmem>>, vector<200x7xbf16>,
    return
  }
}

</mosaic_0001>

<bundles_post_ra>
// kernel: tpu_custom_call.1
= control target key start
LH: loop header
LB: loop body
LE: loop exit
PB: predicated region body
PF: predicated region fallthrough
CT: control target
= control target key end

     0   :  { %vm253_vm0 = vcmask 1041408   ;;  %vm254_vm1 = vcmask 1042432   ;;  %v3608_v0 = vmov 0.0   ;;  %v3609_v2 = vmov 65535   ;;  %s4954_s1 = inlined_call_operand.vmem [shape: bf16[9,5,7], index: 1, kind: input, shape index: {}]   ;;  %s4955_s0 = inlined_call_operand.vmem [shape: bf16[230,5], index: 0, kind: input, shape index: {}]   ;;  %s4956_s2 = inlined_call_operand.vmem [shape: f32[1,7], index: 2, kind: input, shape index: {}]   ;;  %s4957_s3 = inlined_call_operand.vmem [shape: bf16[200,7], index: 3, kind: output, shape index: {}]  }
   0x1   :  { %3072 = vmatprep.subr.bf16.mxu0 %v3608_v0  ;;  %3558 = vmatprep.subr.bf16.mxu1 %v3608_v0  ;;  %v2725_v1 = vld [vmem:[%s4954_s1 + $0x4] sm:$0x7]  ;;  %v255_v3 = vsel %vm253_vm0, 4294967295, %v3609_v2  ;;  %v15_v4 = vld [vmem:[%s4955_s0] sm:$0xf]  ;;  %vm3610_vm2 = vmmov 0  }
   0x2   :  { %v3639_v5 = vsel %vm254_vm1, %v255_v3, 0  ;;  %3074 = vmatprep.mubr.msk.bf16.mxu0 %vm3610_vm2, %v3608_v0  ;;  %3102 = vmatprep.mubr.msk.bf16.mxu1 %vm3610_vm2, %v3608_v0  ;;  %v3648_v6 = vld [vmem:[%s4955_s0 + $0x4] sm:$0xf]  ;;  %v3653_v7 = vld [vmem:[%s4955_s0 + $0x8] sm:$0xff]   ;;  %vm109_vm3 = vsmask.f32 7424 }
   0x3   :  { %v258_v8 = vand.u32 %v2725_v1, %v3639_v5  ;;  %v3657_v9 = vcombine.low %v15_v4, %v3648_v6  ;;  %v3662_v10 = vld [vmem:[%s4955_s0 + $0x38] sm:$0xff]   ;;  %v118_v11 = vshll.u32 %v3653_v7, 16  ;;  %v3668_v12 = vld [vmem:[%s4955_s0 + $0x40] sm:$0xff]   ;;  %v2766_v19 = vld [vmem:[%s4954_s1 + $0x8] sm:$0x7]  ;;  %vm213_vm4 = vcmask 39936  }
   0x4   :  { %v166_v16 = vshll.u32 %v3662_v10, 16  ;;  %v170_v17 = vshrl.u32 %v3662_v10, 16  ;;  %v174_v18 = vshll.u32 %v3668_v12, 16  ;;  %v40_v21 = vld [vmem:[%s4954_s1] sm:$0x7]  ;;  %v3686_v22 = vld [vmem:[%s4955_s0 + $0x10] sm:$0xff]   ;;  %v635_v27 = vand.u32 %v2766_v19, %v3639_v5 }
   0x5   :  { %3073 = vmatpush3.bf16.msra.mxu0 %v258_v8  ;;  %3559 = vmatpush3.bf16.msra.mxu1 %v258_v8  ;;  %v111_v13 = vshrl.u32 %v3657_v9, 16  ;;  %v113_v14 = vshll.u32 %v3657_v9, 16  ;;  %v120_v15 = vrot.slane %v118_v11, 1  ;;  %v3693_v25 = vld [vmem:[%s4955_s0 + $0x48] sm:$0xff]   ;;  %v122_v28 = vshrl.u32 %v3653_v7, 16  ;;  %v3709_v38 = vld [vmem:[%s4955_s0 + $0x18] sm:$0xff]  }
   0x6   :  { %3180 = vmatprep.subr.bf16.mxu0 %v3608_v0  ;;  %3126 = vmatprep.subr.bf16.mxu1 %v3608_v0  ;;  %v3688_v23 = vrot.slane %v166_v16, 1  ;;  %v176_v24 = vrot.slane %v174_v18, 1  ;;  %v126_v29 = vshll.u32 %v3686_v22, 16  ;;  %v425_v31 = vand.u32 %v3639_v5, %v40_v21  ;;  %v3716_v41 = vld [vmem:[%s4955_s0 + $0x50] sm:$0xff]   ;;  %v3732_v48 = vld [vmem:[%s4955_s0 + $0x20] sm:$0xff]   ;;  %v3740_v51 = vld [vmem:[%s4955_s0 + $0x58] sm:$0xff]  }
   0x7   :  { %v115_v20 = vrot.slane %v113_v14, 1  ;;  %v178_v32 = vshrl.u32 %v3668_v12, 16  ;;  %v182_v33 = vshll.u32 %v3693_v25, 16  ;;  %v124_v36 = vor.u32 %v122_v28, %v120_v15  ;;  %v3752_v59 = vld [vmem:[%s4955_s0 + $0x60] sm:$0xf]  ;;  %v3762_v62 = vld [vmem:[%s4955_s0 + $0x28] sm:$0xff]  }
   0x8   :  { %v172_v30 = vor.u32 %v170_v17, %v3688_v23  ;;  %v128_v37 = vrot.slane %v126_v29, 1  ;;  %v130_v43 = vshrl.u32 %v3686_v22, 16  ;;  %v134_v44 = vshll.u32 %v3709_v38, 16  ;;  %v41_v61 = vld [vmem:[%s4955_s0 + $0x64] sm:$0x1]  ;;  %v3785_v19 = vld [vmem:[%s4955_s0 + $0x30] sm:$0xff]  }
   0x9   :  { %v116_v26 = vor.u32 %v115_v20, %v111_v13  ;;  %v180_v39 = vor.u32 %v178_v32, %v176_v24  ;;  %v184_v40 = vrot.slane %v182_v33, 1  ;;  %v186_v46 = vshrl.u32 %v3693_v25, 16 }
   0xa   :  { %v177_v35 = vsel %vm109_vm3, %v172_v30, %v176_v24  ;;  %v129_v42 = vsel %vm109_vm3, %v124_v36, %v128_v37  ;;  %v190_v47 = vshll.u32 %v3716_v41, 16  ;;  %v132_v49 = vor.u32 %v130_v43, %v128_v37  ;;  %v563_v36 = vld [vmem:[%s4955_s0] sm:$0xe]  ;;  %v2781_v37 = vld [vmem:[%s4954_s1 + $0xc] sm:$0x7] }
   0xb   :  { %v121_v34 = vsel %vm109_vm3, %v116_v26, %v120_v15  ;;  %3103 = vmatmul.mubr.msk.bf16.vlgmr.msra.gmra.mxu1 %vm213_vm4, %v177_v35  ;;  %v185_v45 = vsel %vm109_vm3, %v180_v39, %v184_v40  ;;  %v136_v50 = vrot.slane %v134_v44, 1  ;;  %v188_v52 = vor.u32 %v186_v46, %v184_v40 }
   0xc   :  { %3075 = vmatmul.mubr.msk.bf16.vlgmr.msra.gmra.mxu0 %vm213_vm4, %v121_v34  ;;  %3127 = vmatpush3.bf16.msra.mxu1 %v425_v31  ;;  %v192_v53 = vrot.slane %v190_v47, 1  ;;  %v138_v54 = vshrl.u32 %v3709_v38, 16  ;;  %v142_v55 = vshll.u32 %v3732_v48, 16  ;;  %v194_v57 = vshrl.u32 %v3716_v41, 16 }
   0xd   :  { %3181 = vmatpush3.bf16.msra.mxu0 %v635_v27  ;;  %3078 = vmatprep.mubr.msk.bf16.mxu0 %vm3610_vm2, %v3608_v0  ;;  %v137_v56 = vsel %vm109_vm3, %v132_v49, %v136_v50  ;;  %v198_v58 = vshll.u32 %v3740_v51, 16  ;;  %v3770_v4 = vcombine.low %v3752_v59, %v41_v61  ;;  %v146_v8 = vshrl.u32 %v3732_v48, 16  ;;  %v798_v61 = vld [vmem:[%s4955_s0 + $0x4] sm:$0xe] }
   0xe   :  { %3106 = vmatprep.mubr.msk.bf16.mxu1 %vm3610_vm2, %v3608_v0  ;;  %3234 = vmatprep.subr.bf16.mxu1 %v3608_v0  ;;  %v193_v60 = vsel %vm109_vm3, %v188_v52, %v192_v53  ;;  %v140_v63 = vor.u32 %v138_v54, %v136_v50  ;;  %v144_v1 = vrot.slane %v142_v55, 1  ;;  %v196_v3 = vor.u32 %v194_v57, %v192_v53 }
   0xf   :  { %3288 = vmatprep.subr.bf16.mxu0 %v3608_v0  ;;  %v200_v2 = vrot.slane %v198_v58, 1  ;;  %v150_v11 = vshll.u32 %v3762_v62, 16  ;;  %v202_v15 = vshrl.u32 %v3740_v51, 16  ;;  %v206_v16 = vshll.u32 %v3770_v4, 16 }
  0x10   :  { %v145_v13 = vsel %vm109_vm3, %v140_v63, %v144_v1  ;;  %v148_v17 = vor.u32 %v146_v8, %v144_v1  ;;  %v154_v26 = vshrl.u32 %v3762_v62, 16  ;;  %v158_v27 = vshll.u32 %v3785_v19, 16 }
  0x11   :  { %v201_v14 = vsel %vm109_vm3, %v196_v3, %v200_v2  ;;  %v152_v18 = vrot.slane %v150_v11, 1  ;;  %v204_v20 = vor.u32 %v202_v15, %v200_v2  ;;  %v208_v21 = vrot.slane %v206_v16, 1  ;;  %v3946_v2 = vld [vmem:[%s4955_s0 + $0xc] sm:$0xff]  }
  0x12   :  { %v160_v30 = vrot.slane %v158_v27, 1  ;;  %v210_v31 = vshrl.u32 %v3770_v4, 16  ;;  %v162_v34 = vshrl.u32 %v3785_v19, 16  ;;  %v2767_v40 = vcombine.low %v563_v36, %v3648_v6  ;;  %v2808_v6 = vld [vmem:[%s4954_s1 + $0x10] sm:$0x7]  ;;  %v3986_v36 = vld [vmem:[%s4955_s0 + $0x1c] sm:$0xff]  }
  0x13   :  { %3107 = vmatmul.mubr.msk.bf16.gmra.mxu1 %vm213_vm4, %v185_v45  ;;  %v153_v24 = vsel %vm109_vm3, %v148_v17, %v152_v18  ;;  %v209_v28 = vsel %vm109_vm3, %v204_v20, %v208_v21  ;;  %v156_v29 = vor.u32 %v154_v26, %v152_v18  ;;  %v571_v44 = vrot.slane %v3653_v7, 1 }
  0x14   :  { %3079 = vmatmul.mubr.msk.bf16.gmra.mxu0 %vm213_vm4, %v129_v42  ;;  %3110 = vmatprep.mubr.msk.bf16.mxu1 %vm3610_vm2, %v3608_v0  ;;  %v212_v33 = vor.u32 %v210_v31, %v208_v21  ;;  %v164_v35 = vor.u32 %v162_v34, %v160_v30  ;;  %v956_v42 = vand.u32 %v2781_v37, %v3639_v5  ;;  %v570_v43 = vrot.slane %v2767_v40, 1  ;;  %v3965_v21 = vld [vmem:[%s4955_s0 + $0x14] sm:$0xff]  }
  0x15   :  { %3082 = vmatprep.mubr.msk.bf16.mxu0 %vm3610_vm2, %v3608_v0  ;;  %v161_v32 = vsel %vm109_vm3, %v156_v29, %v160_v30  ;;  %vm569_vm5 = vcmask 1046528   ;;  %v573_v45 = vrot.slane %v3686_v22, 1  ;;  %v583_v53 = vrot.slane %v3662_v10, 1  ;;  %v2838_v30 = vld [vmem:[%s4954_s1 + $0x18] sm:$0x7] }
  0x16   :  { %v169_v39 = vsel %vm109_vm3, %v164_v35, %v3688_v23  ;;  %v572_v23 = vsel %vm569_vm5, %v570_v43, %v571_v44  ;;  %v585_v55 = vrot.slane %v3668_v12, 1  ;;  %v1138_v8 = vshll.u32 %v3946_v2, 16 }
  0x17   :  { %v574_v46 = vsel %vm569_vm5, %v571_v44, %v573_v45  ;;  %v1144_v27 = vshrl.u32 %v3965_v21, 16  ;;  %v894_v29 = vrot.slane %v3965_v21, 1  ;;  %vm1125_vm6 = vsmask.f32 6400 }
  0x18   :  { %v1140_v18 = vrot.slane %v1138_v8, 2  ;;  %v1156_v40 = vshll.u32 %v3986_v36, 16  ;;  %vm1451_vm7 = vcmask 1045504   ;;  %vm2007_vm8 = vsmask.f32 5376 }
  0x19   :  { %vm2333_vm9 = vcmask 1044480   ;;  %vm2695_vm10 = vcmask 52224  }
  0x1b   :  { %3111 = vmatmul.mubr.msk.bf16.gmra.mxu1 %vm213_vm4, %v193_v60 }
  0x1c   :  { %3083 = vmatmul.mubr.msk.bf16.gmra.mxu0 %vm213_vm4, %v137_v56  ;;  %3114 = vmatprep.mubr.msk.bf16.mxu1 %vm3610_vm2, %v3608_v0  ;;  %v586_v56 = vsel %vm569_vm5, %v583_v53, %v585_v55 }
  0x1d   :  { %3086 = vmatprep.mubr.msk.bf16.mxu0 %vm3610_vm2, %v3608_v0 }
  0x23   :  { %3115 = vmatmul.mubr.msk.bf16.gmra.mxu1 %vm213_vm4, %v201_v14  ;;  %v2823_v14 = vld [vmem:[%s4954_s1 + $0x14] sm:$0x7] }
  0x24   :  { %3087 = vmatmul.mubr.msk.bf16.gmra.mxu0 %vm213_vm4, %v145_v13  ;;  %3118 = vmatprep.mubr.msk.bf16.mxu1 %vm3610_vm2, %v3608_v0  ;;  %v892_v13 = vrot.slane %v3946_v2, 1  ;;  %v1517_v20 = vand.u32 %v2823_v14, %v3639_v5 }
  0x25   :  { %3090 = vmatprep.mubr.msk.bf16.mxu0 %vm3610_vm2, %v3608_v0 }
  0x26   :  { %v895_v35 = vsel %vm569_vm5, %v892_v13, %v894_v29 }
  0x2b   :  { %3119 = vmatmul.mubr.msk.bf16.gmra.mxu1 %vm213_vm4, %v209_v28  ;;  %v1147_v28 = vshll.u32 %v3965_v21, 16 }
  0x2c   :  { %3091 = vmatmul.mubr.msk.bf16.gmra.mxu0 %vm213_vm4, %v153_v24  ;;  %3122 = vmatprep.mubr.msk.bf16.mxu1 %vm3610_vm2, %v3608_v0 }
  0x2d   :  { %3094 = vmatprep.mubr.msk.bf16.mxu0 %vm3610_vm2, %v3608_v0  ;;  %v1149_v34 = vrot.slane %v1147_v28, 2 }
  0x33   :  { %3123 = vmatmul.mubr.msk.bf16.gmra.mxu1 %vm213_vm4, %v212_v33  ;;  %v1146_v33 = vrot.slane %v1144_v27, 1 }
  0x34   :  { %3095 = vmatmul.mubr.msk.bf16.gmra.mxu0 %vm213_vm4, %v161_v32  ;;  %3128 = vmatprep.mubr.msk.bf16.mxu1 %vm3610_vm2, %v3608_v0  ;;  %v1838_v32 = vand.u32 %v2838_v30, %v3639_v5 }
  0x35   :  { %3098 = vmatprep.mubr.msk.bf16.mxu0 %vm3610_vm2, %v3608_v0  ;;  %v1150_v37 = vor.u32 %v1149_v34, %v1146_v33 }
  0x3b   :  { %3129 = vmatmul.mubr.msk.bf16.vlgmr.msra.gmra.mxu1 %vm213_vm4, %v3657_v9  ;;  %v1282_v9 = vand.u32 %v2808_v6, %v3639_v5  ;;  %v1158_v6 = vrot.slane %v1156_v40, 2 }
  0x3c   :  { %3099 = vmatmul.mubr.msk.bf16.gmra.mxu0 %vm213_vm4, %v169_v39  ;;  %3235 = vmatpush3.bf16.msra.mxu1 %v956_v42  ;;  %v1153_v39 = vshrl.u32 %v3986_v36, 16  ;;  %v896_v42 = vrot.slane %v3986_v36, 1 }
  0x3d   :  { %3182 = vmatprep.mubr.msk.bf16.mxu0 %vm3610_vm2, %v3608_v0  ;;  %3132 = vmatprep.mubr.msk.bf16.mxu1 %vm3610_vm2, %v3608_v0 }
  0x3e   :  { %3342 = vmatprep.subr.bf16.mxu1 %v3608_v0  ;;  %v1155_v44 = vrot.slane %v1153_v39, 1 }
  0x43   :  { %3133 = vmatmul.mubr.msk.bf16.gmra.mxu1 %vm213_vm4, %v3653_v7  ;;  %v575_v7 = vrot.slane %v3709_v38, 1 }
  0x44   :  { %3183 = vmatmul.mubr.msk.bf16.vlgmr.msra.gmra.mxu0 %vm213_vm4, %v572_v23  ;;  %3136 = vmatprep.mubr.msk.bf16.mxu1 %vm3610_vm2, %v3608_v0  ;;  %v897_v23 = vsel %vm569_vm5, %v894_v29, %v896_v42  ;;  %v4075_v29 = vld [vmem:[%s4955_s0 + $0x44] sm:$0xff]  }
  0x45   :  { %3289 = vmatpush3.bf16.msra.mxu0 %v1282_v9  ;;  %3186 = vmatprep.mubr.msk.bf16.mxu0 %vm3610_vm2, %v3608_v0  ;;  %v576_v47 = vsel %vm569_vm5, %v573_v45, %v575_v7  ;;  %v4003_v9 = vld [vmem:[%s4955_s0 + $0x24] sm:$0xff]   ;;  %v1159_v45 = vor.u32 %v1158_v6, %v1155_v44  ;;  %v1198_v34 = vshrl.u32 %v4075_v29, 16  ;;  %v906_v39 = vrot.slane %v4075_v29, 1 }
  0x46   :  { %3396 = vmatprep.subr.bf16.mxu0 %v3608_v0 }
  0x47   :  { %v1200_v6 = vrot.slane %v1198_v34, 1 }
  0x4b   :  { %3137 = vmatmul.mubr.msk.bf16.gmra.mxu1 %vm213_vm4, %v3686_v22  ;;  %v577_v22 = vrot.slane %v3732_v48, 1 }
  0x4c   :  { %3187 = vmatmul.mubr.msk.bf16.gmra.mxu0 %vm213_vm4, %v574_v46  ;;  %3140 = vmatprep.mubr.msk.bf16.mxu1 %vm3610_vm2, %v3608_v0  ;;  %v1162_v46 = vshrl.u32 %v4003_v9, 16 }
  0x4d   :  { %3190 = vmatprep.mubr.msk.bf16.mxu0 %vm3610_vm2, %v3608_v0  ;;  %v578_v49 = vsel %vm569_vm5, %v575_v7, %v577_v22  ;;  %v1165_v7 = vshll.u32 %v4003_v9, 16 }
  0x53   :  { %3141 = vmatmul.mubr.msk.bf16.gmra.mxu1 %vm213_vm4, %v3709_v38  ;;  %v579_v38 = vrot.slane %v3762_v62, 1 }
  0x54   :  { %3191 = vmatmul.mubr.msk.bf16.gmra.mxu0 %vm213_vm4, %v576_v47  ;;  %3144 = vmatprep.mubr.msk.bf16.mxu1 %vm3610_vm2, %v3608_v0  ;;  %v898_v47 = vrot.slane %v4003_v9, 1 }
  0x55   :  { %3194 = vmatprep.mubr.msk.bf16.mxu0 %vm3610_vm2, %v3608_v0  ;;  %v580_v50 = vsel %vm569_vm5, %v577_v22, %v579_v38  ;;  %v1160_v22 = vsel %vm1125_vm6, %v1150_v37, %v1159_v45 }
  0x5b   :  { %3145 = vmatmul.mubr.msk.bf16.gmra.mxu1 %vm213_vm4, %v3732_v48  ;;  %v581_v48 = vrot.slane %v3785_v19, 1 }
  0x5c   :  { %3195 = vmatmul.mubr.msk.bf16.gmra.mxu0 %vm213_vm4, %v578_v49  ;;  %3148 = vmatprep.mubr.msk.bf16.mxu1 %vm3610_vm2, %v3608_v0  ;;  %v1164_v49 = vrot.slane %v1162_v46, 1 }
  0x5d   :  { %3198 = vmatprep.mubr.msk.bf16.mxu0 %vm3610_vm2, %v3608_v0  ;;  %v582_v52 = vsel %vm569_vm5, %v579_v38, %v581_v48  ;;  %v584_v54 = vsel %vm569_vm5, %v581_v48, %v583_v53  ;;  %v1167_v38 = vrot.slane %v1165_v7, 2  ;;  %v4019_v48 = vld [vmem:[%s4955_s0 + $0x2c] sm:$0xff]  }
  0x5e   :  { %v1171_v53 = vshrl.u32 %v4019_v48, 16  ;;  %v4099_v7 = vld [vmem:[%s4955_s0 + $0x4c] sm:$0xff]  }
  0x63   :  { %3149 = vmatmul.mubr.msk.bf16.gmra.mxu1 %vm213_vm4, %v3762_v62  ;;  %v3937_v62 = vld [vmem:[%s4955_s0 + $0x8] sm:$0xf] }
  0x64   :  { %3199 = vmatmul.mubr.msk.bf16.gmra.mxu0 %vm213_vm4, %v580_v50  ;;  %3152 = vmatprep.mubr.msk.bf16.mxu1 %vm3610_vm2, %v3608_v0  ;;  %v2782_v1 = vcombine.low %v798_v61, %v3937_v62  ;;  %v899_v50 = vsel %vm569_vm5, %v896_v42, %v898_v47 }
  0x65   :  { %3202 = vmatprep.mubr.msk.bf16.mxu0 %vm3610_vm2, %v3608_v0 }
  0x66   :  { %v1127_v3 = vshrl.u32 %v2782_v1, 16  ;;  %v891_v11 = vrot.slane %v2782_v1, 1 }
  0x68   :  { %v1129_v15 = vrot.slane %v1127_v3, 1 }
  0x6b   :  { %3153 = vmatmul.mubr.msk.bf16.gmra.mxu1 %vm213_vm4, %v3785_v19  ;;  %v893_v19 = vsel %vm569_vm5, %v891_v11, %v892_v13 }
  0x6c   :  { %3203 = vmatmul.mubr.msk.bf16.gmra.mxu0 %vm213_vm4, %v582_v52  ;;  %3156 = vmatprep.mubr.msk.bf16.mxu1 %vm3610_vm2, %v3608_v0  ;;  %v1168_v52 = vor.u32 %v1167_v38, %v1164_v49 }
  0x6d   :  { %3206 = vmatprep.mubr.msk.bf16.mxu0 %vm3610_vm2, %v3608_v0 }
  0x73   :  { %3157 = vmatmul.mubr.msk.bf16.gmra.mxu1 %vm213_vm4, %v3662_v10  ;;  %v587_v10 = vrot.slane %v3693_v25, 1 }
  0x74   :  { %3207 = vmatmul.mubr.msk.bf16.gmra.mxu0 %vm213_vm4, %v584_v54  ;;  %3160 = vmatprep.mubr.msk.bf16.mxu1 %vm3610_vm2, %v3608_v0  ;;  %v1174_v54 = vshll.u32 %v4019_v48, 16 }
  0x75   :  { %3210 = vmatprep.mubr.msk.bf16.mxu0 %vm3610_vm2, %v3608_v0  ;;  %v588_v57 = vsel %vm569_vm5, %v585_v55, %v587_v10  ;;  %v900_v55 = vrot.slane %v4019_v48, 1 }
  0x7b   :  { %3161 = vmatmul.mubr.msk.bf16.gmra.mxu1 %vm213_vm4, %v3668_v12  ;;  %v589_v12 = vrot.slane %v3716_v41, 1 }
  0x7c   :  { %3211 = vmatmul.mubr.msk.bf16.gmra.mxu0 %vm213_vm4, %v586_v56  ;;  %3164 = vmatprep.mubr.msk.bf16.mxu1 %vm3610_vm2, %v3608_v0  ;;  %v1169_v56 = vsel %vm1125_vm6, %v1159_v45, %v1168_v52 }
  0x7d   :  { %3214 = vmatprep.mubr.msk.bf16.mxu0 %vm3610_vm2, %v3608_v0  ;;  %v590_v58 = vsel %vm569_vm5, %v587_v10, %v589_v12  ;;  %v1173_v10 = vrot.slane %v1171_v53, 1 }
  0x83   :  { %3165 = vmatmul.mubr.msk.bf16.gmra.mxu1 %vm213_vm4, %v3693_v25  ;;  %v591_v25 = vrot.slane %v3740_v51, 1 }
  0x84   :  { %3215 = vmatmul.mubr.msk.bf16.gmra.mxu0 %vm213_vm4, %v588_v57  ;;  %3168 = vmatprep.mubr.msk.bf16.mxu1 %vm3610_vm2, %v3608_v0  ;;  %v1176_v57 = vrot.slane %v1174_v54, 2  ;;  %v908_v54 = vrot.slane %v4099_v7, 1 }
  0x85   :  { %3218 = vmatprep.mubr.msk.bf16.mxu0 %vm3610_vm2, %v3608_v0  ;;  %v592_v60 = vsel %vm569_vm5, %v589_v12, %v591_v25  ;;  %v901_v12 = vsel %vm569_vm5, %v898_v47, %v900_v55 }
  0x8b   :  { %3169 = vmatmul.mubr.msk.bf16.gmra.mxu1 %vm213_vm4, %v3716_v41  ;;  %v593_v41 = vrot.slane %v3770_v4, 1  ;;  %v1130_v4 = vshll.u32 %v2782_v1, 16 }
  0x8c   :  { %3219 = vmatmul.mubr.msk.bf16.gmra.mxu0 %vm213_vm4, %v590_v58  ;;  %3172 = vmatprep.mubr.msk.bf16.mxu1 %vm3610_vm2, %v3608_v0  ;;  %v4035_v58 = vld [vmem:[%s4955_s0 + $0x34] sm:$0xff]  }
  0x8d   :  { %3222 = vmatprep.mubr.msk.bf16.mxu0 %vm3610_vm2, %v3608_v0  ;;  %v594_v63 = vsel %vm569_vm5, %v591_v25, %v593_v41  ;;  %v1132_v16 = vrot.slane %v1130_v4, 2  ;;  %v1177_v25 = vor.u32 %v1176_v57, %v1173_v10  ;;  %v902_v61 = vrot.slane %v4035_v58, 1  ;;  %v4051_v4 = vld [vmem:[%s4955_s0 + $0x3c] sm:$0xff]  }
  0x8e   :  { %v1189_v13 = vshrl.u32 %v4051_v4, 16  ;;  %v1192_v14 = vshll.u32 %v4051_v4, 16 }
  0x8f   :  { %v1133_v24 = vor.u32 %v1132_v16, %v1129_v15  ;;  %v903_v3 = vsel %vm569_vm5, %v900_v55, %v902_v61  ;;  %v904_v16 = vrot.slane %v4051_v4, 1 }
  0x91   :  { %v905_v28 = vsel %vm569_vm5, %v902_v61, %v904_v16  ;;  %v907_v46 = vsel %vm569_vm5, %v904_v16, %v906_v39  ;;  %v4123_v61 = vld [vmem:[%s4955_s0 + $0x54] sm:$0xff]  }
  0x93   :  { %3173 = vmatmul.mubr.msk.bf16.gmra.mxu1 %vm213_vm4, %v3740_v51  ;;  %v2752_v51 = vcombine.low %v3752_v59, %v3752_v59  ;;  %v1135_v59 = vshrl.u32 %v3946_v2, 16 }
  0x94   :  { %3223 = vmatmul.mubr.msk.bf16.gmra.mxu0 %vm213_vm4, %v592_v60  ;;  %3176 = vmatprep.mubr.msk.bf16.mxu1 %vm3610_vm2, %v3608_v0  ;;  %v1180_v60 = vshrl.u32 %v4035_v58, 16 }
  0x95   :  { %3226 = vmatprep.mubr.msk.bf16.mxu0 %vm3610_vm2, %v3608_v0  ;;  %v1137_v17 = vrot.slane %v1135_v59, 1 }
  0x97   :  { %v1141_v26 = vor.u32 %v1140_v18, %v1137_v17 }
  0x99   :  { %v1142_v31 = vsel %vm1125_vm6, %v1133_v24, %v1141_v26  ;;  %v1151_v43 = vsel %vm1125_vm6, %v1141_v26, %v1150_v37  ;;  %v1191_v24 = vrot.slane %v1189_v13, 1  ;;  %v1194_v26 = vrot.slane %v1192_v14, 2 }
  0x9a   :  { %v1219_v13 = vshll.u32 %v4123_v61, 16 }
  0x9b   :  { %3177 = vmatmul.mubr.msk.bf16.gmra.mxu1 %vm213_vm4, %v2752_v51  ;;  %v1178_v51 = vsel %vm1125_vm6, %v1168_v52, %v1177_v25  ;;  %v1195_v33 = vor.u32 %v1194_v26, %v1191_v24  ;;  %v1210_v52 = vshll.u32 %v4099_v7, 16 }
  0x9c   :  { %3227 = vmatmul.mubr.msk.bf16.gmra.mxu0 %vm213_vm4, %v594_v63  ;;  %3236 = vmatprep.mubr.msk.bf16.mxu1 %vm3610_vm2, %v3608_v0  ;;  %v1182_v63 = vrot.slane %v1180_v60, 1 }
  0x9d   :  { %3230 = vmatprep.mubr.msk.bf16.mxu0 %vm3610_vm2, %v3608_v0 }
  0xa3   :  { %3237 = vmatmul.mubr.msk.bf16.vlgmr.msra.gmra.mxu1 %vm213_vm4, %v893_v19 }
  0xa4   :  { %3231 = vmatmul.mubr.msk.bf16.gmra.mxu0 %vm213_vm4, %v593_v41  ;;  %3343 = vmatpush3.bf16.msra.mxu1 %v1517_v20  ;;  %v1183_v41 = vshll.u32 %v4035_v58, 16 }
  0xa5   :  { %3290 = vmatprep.mubr.msk.bf16.mxu0 %vm3610_vm2, %v3608_v0  ;;  %3240 = vmatprep.mubr.msk.bf16.mxu1 %vm3610_vm2, %v3608_v0 }
  0xa6   :  { %3450 = vmatprep.subr.bf16.mxu1 %v3608_v0  ;;  %v1185_v1 = vrot.slane %v1183_v41, 2  ;;  %v909_v41 = vsel %vm569_vm5, %v906_v39, %v908_v54 }
  0xa8   :  { %v1186_v11 = vor.u32 %v1185_v1, %v1182_v63 }
  0xaa   :  { %v1187_v20 = vsel %vm1125_vm6, %v1177_v25, %v1186_v11  ;;  %v1196_v44 = vsel %vm1125_vm6, %v1186_v11, %v1195_v33  ;;  %v1212_v25 = vrot.slane %v1210_v52, 2  ;;  %v1216_v11 = vshrl.u32 %v4123_v61, 16 }
  0xab   :  { %3241 = vmatmul.mubr.msk.bf16.gmra.mxu1 %vm213_vm4, %v895_v35  ;;  %v1201_v35 = vshll.u32 %v4075_v29, 16 }
  0xac   :  { %3291 = vmatmul.mubr.msk.bf16.vlgmr.msra.gmra.mxu0 %vm213_vm4, %v1142_v31  ;;  %3244 = vmatprep.mubr.msk.bf16.mxu1 %vm3610_vm2, %v3608_v0  ;;  %v1218_v26 = vrot.slane %v1216_v11, 1 }
  0xad   :  { %3397 = vmatpush3.bf16.msra.mxu0 %v1838_v32  ;;  %3294 = vmatprep.mubr.msk.bf16.mxu0 %vm3610_vm2, %v3608_v0 }
  0xae   :  { %3504 = vmatprep.subr.bf16.mxu0 %v3608_v0 }
  0xb3   :  { %3245 = vmatmul.mubr.msk.bf16.gmra.mxu1 %vm213_vm4, %v897_v23  ;;  %v1203_v23 = vrot.slane %v1201_v35, 2 }
  0xb4   :  { %3295 = vmatmul.mubr.msk.bf16.gmra.mxu0 %vm213_vm4, %v1151_v43  ;;  %3248 = vmatprep.mubr.msk.bf16.mxu1 %vm3610_vm2, %v3608_v0 }
  0xb5   :  { %3298 = vmatprep.mubr.msk.bf16.mxu0 %vm3610_vm2, %v3608_v0  ;;  %v1204_v38 = vor.u32 %v1203_v23, %v1200_v6 }
  0xb7   :  { %v1205_v57 = vsel %vm1125_vm6, %v1195_v33, %v1204_v38  ;;  %v4147_v33 = vld [vmem:[%s4955_s0 + $0x5c] sm:$0xff]  }
  0xb8   :  { %v912_v23 = vrot.slane %v4147_v33, 1 }
  0xbb   :  { %3249 = vmatmul.mubr.msk.bf16.gmra.mxu1 %vm213_vm4, %v899_v50  ;;  %v1207_v50 = vshrl.u32 %v4099_v7, 16 }
  0xbc   :  { %3299 = vmatmul.mubr.msk.bf16.gmra.mxu0 %vm213_vm4, %v1160_v22  ;;  %3252 = vmatprep.mubr.msk.bf16.mxu1 %vm3610_vm2, %v3608_v0 }
  0xbd   :  { %3302 = vmatprep.mubr.msk.bf16.mxu0 %vm3610_vm2, %v3608_v0 }
  0xc3   :  { %3253 = vmatmul.mubr.msk.bf16.gmra.mxu1 %vm213_vm4, %v901_v12  ;;  %v1209_v12 = vrot.slane %v1207_v50, 1 }
  0xc4   :  { %3303 = vmatmul.mubr.msk.bf16.gmra.mxu0 %vm213_vm4, %v1169_v56  ;;  %3256 = vmatprep.mubr.msk.bf16.mxu1 %vm3610_vm2, %v3608_v0 }
  0xc5   :  { %3306 = vmatprep.mubr.msk.bf16.mxu0 %vm3610_vm2, %v3608_v0 }
  0xcb   :  { %v4056_v8 = vpop.f32.mrf.mxu1  ;;  %3257 = vmatmul.mubr.msk.bf16.gmra.mxu1 %vm213_vm4, %v903_v3  ;;  %v1213_v3 = vor.u32 %v1212_v25, %v1209_v12 }
  0xcc   :  { %v4053_v59 = vpop.f32.mrf.mxu0  ;;  %3307 = vmatmul.mubr.msk.bf16.gmra.mxu0 %vm213_vm4, %v1178_v51  ;;  %3260 = vmatprep.mubr.msk.bf16.mxu1 %vm3610_vm2, %v3608_v0 }
  0xcd   :  { %3310 = vmatprep.mubr.msk.bf16.mxu0 %vm3610_vm2, %v3608_v0  ;;  %v3104_v17 = vpop.f32.mrf.mxu1  ;;  %v1214_v24 = vsel %vm1125_vm6, %v1204_v38, %v1213_v3  ;;  %v823_v38 = vld [vmem:[%s4955_s0 + $0x68] sm:$0x1] }
  0xce   :  { %v3076_v15 = vpop.f32.mrf.mxu0 }
  0xcf   :  { %v4068_v19 = vpop.f32.mrf.mxu1  ;;  %v910_v15 = vrot.slane %v4123_v61, 1 }
  0xd0   :  { %v4066_v18 = vpop.f32.mrf.mxu0 }
  0xd1   :  { %v3105_v30 = vpop.f32.mrf.mxu1  ;;  %v913_v25 = vsel %vm569_vm5, %v910_v15, %v912_v23 }
  0xd2   :  { %v3077_v27 = vpop.f32.mrf.mxu0  ;;  %v911_v30 = vsel %vm569_vm5, %v908_v54, %v910_v15 }
  0xd3   :  { %v4080_v32 = vpop.f32.mrf.mxu1  ;;  %3261 = vmatmul.mubr.msk.bf16.gmra.mxu1 %vm213_vm4, %v905_v28  ;;  %v1221_v27 = vrot.slane %v1219_v13, 2 }
  0xd4   :  { %v4077_v31 = vpop.f32.mrf.mxu0  ;;  %3311 = vmatmul.mubr.msk.bf16.gmra.mxu0 %vm213_vm4, %v1187_v20  ;;  %3264 = vmatprep.mubr.msk.bf16.mxu1 %vm3610_vm2, %v3608_v0 }
  0xd5   :  { %3314 = vmatprep.mubr.msk.bf16.mxu0 %vm3610_vm2, %v3608_v0  ;;  %v3108_v40 = vpop.f32.mrf.mxu1  ;;  %v1222_v39 = vor.u32 %v1221_v27, %v1218_v26 }
  0xd6   :  { %v3080_v37 = vpop.f32.mrf.mxu0  ;;  %v1225_v40 = vshrl.u32 %v4147_v33, 16 }
  0xd7   :  { %v4092_v43 = vpop.f32.mrf.mxu1 }
  0xd8   :  { %v4090_v42 = vpop.f32.mrf.mxu0 }
  0xd9   :  { %v3109_v47 = vpop.f32.mrf.mxu1 }
  0xda   :  { %v3081_v45 = vpop.f32.mrf.mxu0  ;;  %v822_v47 = vld [vmem:[%s4955_s0 + $0x64] sm:$0xf] }
  0xdb   :  { %v4104_v49 = vpop.f32.mrf.mxu1  ;;  %3265 = vmatmul.mubr.msk.bf16.gmra.mxu1 %vm213_vm4, %v907_v46  ;;  %v1119_v45 = vld [vmem:[%s4955_s0 + $0x68] sm:$0x3] }
  0xdc   :  { %v4101_v22 = vpop.f32.mrf.mxu0  ;;  %3315 = vmatmul.mubr.msk.bf16.gmra.mxu0 %vm213_vm4, %v1196_v44  ;;  %3268 = vmatprep.mubr.msk.bf16.mxu1 %vm3610_vm2, %v3608_v0  ;;  %v1228_v44 = vshll.u32 %v4147_v33, 16  ;;  %v4176_v54 = vcombine.low %v822_v47, %v1119_v45 }
  0xdd   :  { %3318 = vmatprep.mubr.msk.bf16.mxu0 %vm3610_vm2, %v3608_v0  ;;  %v3112_v55 = vpop.f32.mrf.mxu1 }
  0xde   :  { %v3084_v53 = vpop.f32.mrf.mxu0  ;;  %v1227_v55 = vrot.slane %v1225_v40, 1  ;;  %v1234_v13 = vshrl.u32 %v4176_v54, 16 }
  0xdf   :  { %v4116_v10 = vpop.f32.mrf.mxu1  ;;  %v1223_v53 = vsel %vm1125_vm6, %v1213_v3, %v1222_v39 }
  0xe0   :  { %v4114_v56 = vpop.f32.mrf.mxu0 }
  0xe1   :  { %v3113_v51 = vpop.f32.mrf.mxu1 }
  0xe2   :  { %v3085_v60 = vpop.f32.mrf.mxu0 }
  0xe3   :  { %v4128_v1 = vpop.f32.mrf.mxu1  ;;  %3269 = vmatmul.mubr.msk.bf16.gmra.mxu1 %vm213_vm4, %v909_v41  ;;  %v2794_v60 = vcombine.low %v822_v47, %v823_v38 }
  0xe4   :  { %v4125_v63 = vpop.f32.mrf.mxu0  ;;  %3319 = vmatmul.mubr.msk.bf16.gmra.mxu0 %vm213_vm4, %v1205_v57  ;;  %3272 = vmatprep.mubr.msk.bf16.mxu1 %vm3610_vm2, %v3608_v0  ;;  %v1230_v57 = vrot.slane %v1228_v44, 2 }
  0xe5   :  { %3322 = vmatprep.mubr.msk.bf16.mxu0 %vm3610_vm2, %v3608_v0  ;;  %v3116_v16 = vpop.f32.mrf.mxu1  ;;  %v914_v15 = vrot.slane %v2794_v60, 1 }
  0xe6   :  { %v3088_v14 = vpop.f32.mrf.mxu0  ;;  %v1231_v3 = vor.u32 %v1230_v57, %v1227_v55 }
  0xe7   :  { %v4140_v20 = vpop.f32.mrf.mxu1  ;;  %v1237_v14 = vshll.u32 %v4176_v54, 16  ;;  %v915_v44 = vsel %vm569_vm5, %v912_v23, %v914_v15  ;;  %v1445_v23 = vld [vmem:[%s4955_s0 + $0x4] sm:$0xc] }
  0xe8   :  { %v4138_v17 = vpop.f32.mrf.mxu0 }
  0xe9   :  { %v3117_v34 = vpop.f32.mrf.mxu1 }
  0xea   :  { %v3089_v28 = vpop.f32.mrf.mxu0  ;;  %v1239_v34 = vrot.slane %v1237_v14, 2 }
  0xeb   :  { %v4152_v37 = vpop.f32.mrf.mxu1  ;;  %3273 = vmatmul.mubr.msk.bf16.gmra.mxu1 %vm213_vm4, %v911_v30  ;;  %v1232_v28 = vsel %vm1125_vm6, %v1222_v39, %v1231_v3  ;;  %v1236_v30 = vrot.slane %v1234_v13, 1 }
  0xec   :  { %v4149_v35 = vpop.f32.mrf.mxu0  ;;  %3323 = vmatmul.mubr.msk.bf16.gmra.mxu0 %vm213_vm4, %v1214_v24  ;;  %3276 = vmatprep.mubr.msk.bf16.mxu1 %vm3610_vm2, %v3608_v0 }
  0xed   :  { %3326 = vmatprep.mubr.msk.bf16.mxu0 %vm3610_vm2, %v3608_v0  ;;  %v3120_v46 = vpop.f32.mrf.mxu1  ;;  %v1240_v47 = vor.u32 %v1239_v34, %v1236_v30 }
  0xee   :  { %v3092_v6 = vpop.f32.mrf.mxu0 }
  0xef   :  { %v4173_v52 = vpop.f32.mrf.mxu1 }
  0xf0   :  { %v4171_v50 = vpop.f32.mrf.mxu0 }
  0xf1   :  { %v3121_v41 = vpop.f32.mrf.mxu1 }
  0xf2   :  { %v3093_v12 = vpop.f32.mrf.mxu0  ;;  %v2824_v41 = vcombine.low %v1445_v23, %v3937_v62  ;;  %v1453_v62 = vrot.slane %v3946_v2, 2 }
  0xf3   :  { %v4182_v11 = vpop.f32.mrf.mxu1  ;;  %3277 = vmatmul.mubr.msk.bf16.gmra.mxu1 %vm213_vm4, %v913_v25  ;;  %v1241_v12 = vsel %vm1125_vm6, %v1231_v3, %v1240_v47 }
  0xf4   :  { %v4179_v51 = vpop.f32.mrf.mxu0  ;;  %3327 = vmatmul.mubr.msk.bf16.gmra.mxu0 %vm213_vm4, %v1223_v53  ;;  %3280 = vmatprep.mubr.msk.bf16.mxu1 %vm3610_vm2, %v3608_v0 }
  0xf5   :  { %3330 = vmatprep.mubr.msk.bf16.mxu0 %vm3610_vm2, %v3608_v0  ;;  %v3124_v24 = vpop.f32.mrf.mxu1 }
  0xf6   :  { %v3096_v16 = vpop.f32.mrf.mxu0 }
  0xf7   :  { %v393_v27 = vpop.f32.mrf.mxu1 }
  0xf8   :  { %v4191_v26 = vpop.f32.mrf.mxu0  ;;  %v1680_v27 = vld [vmem:[%s4955_s0 + $0x8] sm:$0xc] }
  0xf9   :  { %v3125_v6 = vpop.f32.mrf.mxu1 }
  0xfa   :  { %v3097_v40 = vpop.f32.mrf.mxu0 }
  0xfb   :  { %v461_v46 = vpop.f32.mrf.mxu1  ;;  %3281 = vmatmul.mubr.msk.bf16.gmra.mxu1 %vm213_vm4, %v915_v44  ;;  %v4241_v44 = vld [vmem:[%s4955_s0 + $0x10] sm:$0xff]  }
  0xfc   :  { %v4195_v45 = vpop.f32.mrf.mxu0  ;;  %3331 = vmatmul.mubr.msk.bf16.gmra.mxu0 %vm213_vm4, %v1232_v28  ;;  %v462_v38 = vadd.f32 %v461_v46, %v4053_v59  ;;  %3284 = vmatprep.mubr.msk.bf16.mxu1 %vm3610_vm2, %v3608_v0 }
  0xfd   :  { %3334 = vmatprep.mubr.msk.bf16.mxu0 %vm3610_vm2, %v3608_v0  ;;  %v3130_v53 = vpop.f32.mrf.mxu1 }
  0xfe   :  { %v3100_v39 = vpop.f32.mrf.mxu0 }
  0xff   :  { %v464_v57 = vpop.f32.mrf.mxu1 }
 0x100   :  { %v4207_v55 = vpop.f32.mrf.mxu0  ;;  %v465_v25 = vadd.f32 %v464_v57, %v4066_v18  ;;  %v1452_v18 = vrot.slane %v2824_v41, 2 }
 0x101   :  { %v3131_v59 = vpop.f32.mrf.mxu1 }
 0x102   :  { %v3101_v60 = vpop.f32.mrf.mxu0  ;;  %v2880_v59 = vld [vmem:[%s4954_s1 + $0x20] sm:$0x7] }
 0x103   :  { %v469_v14 = vpop.f32.mrf.mxu1  ;;  %3285 = vmatmul.mubr.msk.bf16.gmra.mxu1 %vm213_vm4, %v914_v15  ;;  %v4228_v15 = vld [vmem:[%s4955_s0 + $0xc] sm:$0xf] }
 0x104   :  { %v671_v13 = vpop.f32.mrf.mxu0  ;;  %3335 = vmatmul.mubr.msk.bf16.gmra.mxu0 %vm213_vm4, %v1241_v12  ;;  %v470_v24 = vadd.f32 %v469_v14, %v4077_v31  ;;  %3344 = vmatprep.mubr.msk.bf16.mxu1 %vm3610_vm2, %v3608_v0  ;;  %v2865_v31 = vld [vmem:[%s4954_s1 + $0x1c] sm:$0x7]  ;;  %v4236_v2 = vcombine.low %v1680_v27, %v4228_v15 }
 0x105   :  { %v4213_v16 = vadd.f32 %v671_v13, %v462_v38  ;;  %3338 = vmatprep.mubr.msk.bf16.mxu0 %vm3610_vm2, %v3608_v0  ;;  %v3134_v28 = vpop.f32.mrf.mxu1  ;;  %v1454_v38 = vsel %vm1451_vm7, %v1452_v18, %v1453_v62  ;;  %v2164_v39 = vand.u32 %v2865_v31, %v3639_v5  ;;  %v4268_v27 = vld [vmem:[%s4955_s0 + $0x18] sm:$0xff]  }
 0x106   :  { %v3184_v3 = vpop.f32.mrf.mxu0 }
 0x107   :  { %v472_v34 = vpop.f32.mrf.mxu1 }
 0x108   :  { %v674_v30 = vpop.f32.mrf.mxu0  ;;  %v473_v6 = vadd.f32 %v472_v34, %v4090_v42  ;;  %v1774_v42 = vrot.slane %v4241_v44, 2 }
 0x109   :  { %v4233_v40 = vadd.f32 %v674_v30, %v465_v25  ;;  %v3135_v53 = vpop.f32.mrf.mxu1  ;;  %v1773_v25 = vrot.slane %v4236_v2, 2 }
 0x10a   :  { %v3185_v46 = vpop.f32.mrf.mxu0 }
 0x10b   :  { %v477_v57 = vpop.f32.mrf.mxu1  ;;  %3345 = vmatmul.mubr.msk.bf16.vlgmr.msra.gmra.mxu1 %vm213_vm4, %v1454_v38  ;;  %v1775_v18 = vsel %vm1451_vm7, %v1773_v25, %v1774_v42 }
 0x10c   :  { %v679_v23 = vpop.f32.mrf.mxu0  ;;  %3339 = vmatmul.mubr.msk.bf16.gmra.mxu0 %vm213_vm4, %v1240_v47  ;;  %v478_v60 = vadd.f32 %v477_v57, %v4101_v22  ;;  %3451 = vmatpush3.bf16.msra.mxu1 %v2164_v39  ;;  %v1455_v47 = vrot.slane %v3965_v21, 2  ;;  %v2399_v22 = vand.u32 %v2880_v59, %v3639_v5  ;;  %v1776_v5 = vrot.slane %v4268_v27, 2 }
 0x10d   :  { %v4247_v12 = vadd.f32 %v679_v23, %v470_v24  ;;  %3398 = vmatprep.mubr.msk.bf16.mxu0 %vm3610_vm2, %v3608_v0  ;;  %3348 = vmatprep.mubr.msk.bf16.mxu1 %vm3610_vm2, %v3608_v0  ;;  %v3138_v13 = vpop.f32.mrf.mxu1 }
 0x10e   :  { %v3188_v41 = vpop.f32.mrf.mxu0  ;;  %v1456_v31 = vsel %vm1451_vm7, %v1453_v62, %v1455_v47  ;;  %v1777_v25 = vsel %vm1451_vm7, %v1774_v42, %v1776_v5 }
 0x10f   :  { %v480_v24 = vpop.f32.mrf.mxu1 }
 0x110   :  { %v682_v14 = vpop.f32.mrf.mxu0  ;;  %v481_v21 = vadd.f32 %v480_v24, %v4114_v56  ;;  %v1457_v56 = vrot.slane %v3986_v36, 2 }
 0x111   :  { %v4261_v3 = vadd.f32 %v682_v14, %v473_v6  ;;  %v3139_v30 = vpop.f32.mrf.mxu1 }
 0x112   :  { %v3189_v28 = vpop.f32.mrf.mxu0  ;;  %v1458_v59 = vsel %vm1451_vm7, %v1455_v47, %v1457_v56  ;;  %v1459_v47 = vrot.slane %v4003_v9, 2 }
 0x113   :  { %v485_v6 = vpop.f32.mrf.mxu1  ;;  %3349 = vmatmul.mubr.msk.bf16.gmra.mxu1 %vm213_vm4, %v1456_v31 }
 0x114   :  { %v687_v34 = vpop.f32.mrf.mxu0  ;;  %3399 = vmatmul.mubr.msk.bf16.vlgmr.msra.gmra.mxu0 %vm213_vm4, %v1775_v18  ;;  %v486_v38 = vadd.f32 %v485_v6, %v4125_v63  ;;  %3352 = vmatprep.mubr.msk.bf16.mxu1 %vm3610_vm2, %v3608_v0  ;;  %v4289_v63 = vld [vmem:[%s4955_s0 + $0x20] sm:$0xff]  }
 0x115   :  { %v4273_v46 = vadd.f32 %v687_v34, %v478_v60  ;;  %3505 = vmatpush3.bf16.msra.mxu0 %v2399_v22  ;;  %3402 = vmatprep.mubr.msk.bf16.mxu0 %vm3610_vm2, %v3608_v0  ;;  %v3142_v62 = vpop.f32.mrf.mxu1  ;;  %v1778_v42 = vrot.slane %v4289_v63, 2  ;;  %v4310_v34 = vld [vmem:[%s4955_s0 + $0x28] sm:$0xff]  }
 0x116   :  { %v3192_v39 = vpop.f32.mrf.mxu0 }
 0x117   :  { %v488_v23 = vpop.f32.mrf.mxu1  ;;  %v1779_v30 = vsel %vm1451_vm7, %v1776_v5, %v1778_v42  ;;  %v1780_v5 = vrot.slane %v4310_v34, 2 }
 0x118   :  { %v690_v53 = vpop.f32.mrf.mxu0  ;;  %v489_v60 = vadd.f32 %v488_v23, %v4138_v17 }
 0x119   :  { %v4283_v57 = vadd.f32 %v690_v53, %v481_v21  ;;  %v3143_v13 = vpop.f32.mrf.mxu1 }
 0x11a   :  { %v3193_v41 = vpop.f32.mrf.mxu0  ;;  %v1781_v13 = vsel %vm1451_vm7, %v1778_v42, %v1780_v5 }
 0x11b   :  { %v493_v36 = vpop.f32.mrf.mxu1  ;;  %3353 = vmatmul.mubr.msk.bf16.gmra.mxu1 %vm213_vm4, %v1458_v59 }
 0x11c   :  { %v695_v14 = vpop.f32.mrf.mxu0  ;;  %3403 = vmatmul.mubr.msk.bf16.gmra.mxu0 %vm213_vm4, %v1777_v25  ;;  %v494_v18 = vadd.f32 %v493_v36, %v4149_v35  ;;  %3356 = vmatprep.mubr.msk.bf16.mxu1 %vm3610_vm2, %v3608_v0 }
 0x11d   :  { %v4294_v24 = vadd.f32 %v695_v14, %v486_v38  ;;  %3406 = vmatprep.mubr.msk.bf16.mxu0 %vm3610_vm2, %v3608_v0  ;;  %v3146_v22 = vpop.f32.mrf.mxu1  ;;  %v1460_v38 = vsel %vm1451_vm7, %v1457_v56, %v1459_v47  ;;  %v1461_v56 = vrot.slane %v4019_v48, 2  ;;  %v4331_v14 = vld [vmem:[%s4955_s0 + $0x30] sm:$0xff]  }
 0x11e   :  { %v3196_v17 = vpop.f32.mrf.mxu0  ;;  %v1782_v42 = vrot.slane %v4331_v14, 2 }
 0x11f   :  { %v496_v28 = vpop.f32.mrf.mxu1 }
 0x120   :  { %v698_v21 = vpop.f32.mrf.mxu0  ;;  %v497_v35 = vadd.f32 %v496_v28, %v4171_v50 }
 0x121   :  { %v4304_v31 = vadd.f32 %v698_v21, %v489_v60  ;;  %v3147_v39 = vpop.f32.mrf.mxu1 }
 0x122   :  { %v3197_v6 = vpop.f32.mrf.mxu0  ;;  %v1783_v39 = vsel %vm1451_vm7, %v1780_v5, %v1782_v42 }
 0x123   :  { %v501_v9 = vpop.f32.mrf.mxu1  ;;  %3357 = vmatmul.mubr.msk.bf16.gmra.mxu1 %vm213_vm4, %v1460_v38 }
 0x124   :  { %v703_v62 = vpop.f32.mrf.mxu0  ;;  %3407 = vmatmul.mubr.msk.bf16.gmra.mxu0 %vm213_vm4, %v1779_v30  ;;  %v502_v23 = vadd.f32 %v501_v9, %v4179_v51  ;;  %3360 = vmatprep.mubr.msk.bf16.mxu1 %vm3610_vm2, %v3608_v0 }
 0x125   :  { %v4315_v53 = vadd.f32 %v703_v62, %v494_v18  ;;  %3410 = vmatprep.mubr.msk.bf16.mxu0 %vm3610_vm2, %v3608_v0  ;;  %v3150_v25 = vpop.f32.mrf.mxu1  ;;  %v1462_v18 = vsel %vm1451_vm7, %v1459_v47, %v1461_v56  ;;  %v1463_v47 = vrot.slane %v4035_v58, 2  ;;  %v4352_v62 = vld [vmem:[%s4955_s0 + $0x38] sm:$0xff]  }
 0x126   :  { %v3200_v50 = vpop.f32.mrf.mxu0  ;;  %v1784_v5 = vrot.slane %v4352_v62, 2 }
 0x127   :  { %v504_v41 = vpop.f32.mrf.mxu1 }
 0x128   :  { %v706_v60 = vpop.f32.mrf.mxu0  ;;  %v505_v51 = vadd.f32 %v504_v41, %v4191_v26 }
 0x129   :  { %v4325_v59 = vadd.f32 %v706_v60, %v497_v35  ;;  %v3151_v17 = vpop.f32.mrf.mxu1 }
 0x12a   :  { %v3201_v36 = vpop.f32.mrf.mxu0  ;;  %v4372_v17 = vld [vmem:[%s4955_s0 + $0x40] sm:$0xff]  }
 0x12b   :  { %v509_v48 = vpop.f32.mrf.mxu1  ;;  %3361 = vmatmul.mubr.msk.bf16.gmra.mxu1 %vm213_vm4, %v1462_v18  ;;  %v1785_v18 = vsel %vm1451_vm7, %v1782_v42, %v1784_v5  ;;  %v1786_v42 = vrot.slane %v4372_v17, 2 }
 0x12c   :  { %v711_v22 = vpop.f32.mrf.mxu0  ;;  %3411 = vmatmul.mubr.msk.bf16.gmra.mxu0 %vm213_vm4, %v1781_v13  ;;  %v510_v28 = vadd.f32 %v509_v48, %v4195_v45  ;;  %3364 = vmatprep.mubr.msk.bf16.mxu1 %vm3610_vm2, %v3608_v0 }
 0x12d   :  { %v4336_v21 = vadd.f32 %v711_v22, %v502_v23  ;;  %3414 = vmatprep.mubr.msk.bf16.mxu0 %vm3610_vm2, %v3608_v0  ;;  %v3154_v30 = vpop.f32.mrf.mxu1  ;;  %v1464_v23 = vsel %vm1451_vm7, %v1461_v56, %v1463_v47 }
 0x12e   :  { %v3204_v26 = vpop.f32.mrf.mxu0 }
 0x12f   :  { %v512_v6 = vpop.f32.mrf.mxu1 }
 0x130   :  { %v714_v35 = vpop.f32.mrf.mxu0  ;;  %v513_v45 = vadd.f32 %v512_v6, %v4207_v55  ;;  %v1465_v55 = vrot.slane %v4051_v4, 2 }
 0x131   :  { %v4346_v38 = vadd.f32 %v714_v35, %v505_v51  ;;  %v3155_v50 = vpop.f32.mrf.mxu1 }
 0x132   :  { %v3205_v9 = vpop.f32.mrf.mxu0  ;;  %v1466_v48 = vsel %vm1451_vm7, %v1463_v47, %v1465_v55  ;;  %v1787_v50 = vsel %vm1451_vm7, %v1784_v5, %v1786_v42 }
 0x133   :  { %v517_v58 = vpop.f32.mrf.mxu1  ;;  %3365 = vmatmul.mubr.msk.bf16.gmra.mxu1 %vm213_vm4, %v1464_v23 }
 0x134   :  { %v719_v25 = vpop.f32.mrf.mxu0  ;;  %3415 = vmatmul.mubr.msk.bf16.gmra.mxu0 %vm213_vm4, %v1783_v39  ;;  %3368 = vmatprep.mubr.msk.bf16.mxu1 %vm3610_vm2, %v3608_v0 }
 0x135   :  { %v4357_v60 = vadd.f32 %v719_v25, %v510_v28  ;;  %3418 = vmatprep.mubr.msk.bf16.mxu0 %vm3610_vm2, %v3608_v0  ;;  %v3158_v56 = vpop.f32.mrf.mxu1  ;;  %v518_v28 = vadd.f32 %v517_v58, %v4056_v8  ;;  %v1467_v8 = vrot.slane %v4075_v29, 2  ;;  %v4393_v25 = vld [vmem:[%s4955_s0 + $0x48] sm:$0xff]  }
 0x136   :  { %v3208_v41 = vpop.f32.mrf.mxu0  ;;  %v1788_v5 = vrot.slane %v4393_v25, 2 }
 0x137   :  { %v520_v51 = vpop.f32.mrf.mxu1  ;;  %v1468_v41 = vsel %vm1451_vm7, %v1465_v55, %v1467_v8 }
 0x138   :  { %v722_v13 = vpop.f32.mrf.mxu0  ;;  %v521_v47 = vadd.f32 %v520_v51, %v4068_v19 }
 0x139   :  { %v4366_v36 = vadd.f32 %v722_v13, %v513_v45  ;;  %v3159_v26 = vpop.f32.mrf.mxu1 }
 0x13a   :  { %v3209_v22 = vpop.f32.mrf.mxu0 }
 0x13b   :  { %v525_v4 = vpop.f32.mrf.mxu1  ;;  %3369 = vmatmul.mubr.msk.bf16.gmra.mxu1 %vm213_vm4, %v1466_v48 }
 0x13c   :  { %v727_v30 = vpop.f32.mrf.mxu0  ;;  %3419 = vmatmul.mubr.msk.bf16.gmra.mxu0 %vm213_vm4, %v1785_v18  ;;  %3372 = vmatprep.mubr.msk.bf16.mxu1 %vm3610_vm2, %v3608_v0  ;;  %v526_v56 = vadd.f32 %v525_v4, %v4080_v32  ;;  %v1469_v32 = vrot.slane %v4099_v7, 2  ;;  %v4414_v4 = vld [vmem:[%s4955_s0 + $0x50] sm:$0xff]  }
 0x13d   :  { %v4377_v35 = vadd.f32 %v727_v30, %v518_v28  ;;  %3422 = vmatprep.mubr.msk.bf16.mxu0 %vm3610_vm2, %v3608_v0  ;;  %v3162_v39 = vpop.f32.mrf.mxu1  ;;  %v1789_v30 = vsel %vm1451_vm7, %v1786_v42, %v1788_v5  ;;  %v1790_v42 = vrot.slane %v4414_v4, 2 }
 0x13e   :  { %v3212_v6 = vpop.f32.mrf.mxu0 }
 0x13f   :  { %v528_v9 = vpop.f32.mrf.mxu1 }
 0x140   :  { %v730_v45 = vpop.f32.mrf.mxu0  ;;  %v529_v55 = vadd.f32 %v528_v9, %v4092_v43 }
 0x141   :  { %v4387_v23 = vadd.f32 %v730_v45, %v521_v47  ;;  %v3163_v29 = vpop.f32.mrf.mxu1  ;;  %v1470_v47 = vsel %vm1451_vm7, %v1467_v8, %v1469_v32 }
 0x142   :  { %v3213_v58 = vpop.f32.mrf.mxu0 }
 0x143   :  { %v533_v19 = vpop.f32.mrf.mxu1  ;;  %3373 = vmatmul.mubr.msk.bf16.gmra.mxu1 %vm213_vm4, %v1468_v41 }
 0x144   :  { %v735_v13 = vpop.f32.mrf.mxu0  ;;  %3423 = vmatmul.mubr.msk.bf16.gmra.mxu0 %vm213_vm4, %v1787_v50  ;;  %3376 = vmatprep.mubr.msk.bf16.mxu1 %vm3610_vm2, %v3608_v0  ;;  %v534_v39 = vadd.f32 %v533_v19, %v4104_v49  ;;  %v1471_v49 = vrot.slane %v4123_v61, 2  ;;  %v4435_v19 = vld [vmem:[%s4955_s0 + $0x58] sm:$0xff]  }
 0x145   :  { %v4398_v51 = vadd.f32 %v735_v13, %v526_v56  ;;  %3426 = vmatprep.mubr.msk.bf16.mxu0 %vm3610_vm2, %v3608_v0  ;;  %v3166_v22 = vpop.f32.mrf.mxu1  ;;  %v1791_v13 = vsel %vm1451_vm7, %v1788_v5, %v1790_v42  ;;  %v1792_v5 = vrot.slane %v4435_v19, 2 }
 0x146   :  { %v3216_v18 = vpop.f32.mrf.mxu0 }
 0x147   :  { %v536_v28 = vpop.f32.mrf.mxu1 }
 0x148   :  { %v738_v48 = vpop.f32.mrf.mxu0  ;;  %v537_v8 = vadd.f32 %v536_v28, %v4116_v10 }
 0x149   :  { %v4408_v26 = vadd.f32 %v738_v48, %v529_v55  ;;  %v3167_v7 = vpop.f32.mrf.mxu1  ;;  %v1472_v55 = vsel %vm1451_vm7, %v1469_v32, %v1471_v49 }
 0x14a   :  { %v3217_v6 = vpop.f32.mrf.mxu0 }
 0x14b   :  { %v541_v43 = vpop.f32.mrf.mxu1  ;;  %3377 = vmatmul.mubr.msk.bf16.gmra.mxu1 %vm213_vm4, %v1470_v47 }
 0x14c   :  { %v743_v45 = vpop.f32.mrf.mxu0  ;;  %3427 = vmatmul.mubr.msk.bf16.gmra.mxu0 %vm213_vm4, %v1789_v30  ;;  %3380 = vmatprep.mubr.msk.bf16.mxu1 %vm3610_vm2, %v3608_v0  ;;  %v542_v22 = vadd.f32 %v541_v43, %v4128_v1  ;;  %v1473_v1 = vrot.slane %v4147_v33, 2  ;;  %v4456_v43 = vld [vmem:[%s4955_s0 + $0x60] sm:$0xff]  }
 0x14d   :  { %v4419_v9 = vadd.f32 %v743_v45, %v534_v39  ;;  %3430 = vmatprep.mubr.msk.bf16.mxu0 %vm3610_vm2, %v3608_v0  ;;  %v3170_v58 = vpop.f32.mrf.mxu1  ;;  %v1793_v45 = vsel %vm1451_vm7, %v1790_v42, %v1792_v5  ;;  %v1794_v42 = vrot.slane %v4456_v43, 2 }
 0x14e   :  { %v3220_v50 = vpop.f32.mrf.mxu0 }
 0x14f   :  { %v544_v56 = vpop.f32.mrf.mxu1 }
 0x150   :  { %v746_v41 = vpop.f32.mrf.mxu0  ;;  %v545_v32 = vadd.f32 %v544_v56, %v4140_v20 }
 0x151   :  { %v4429_v29 = vadd.f32 %v746_v41, %v537_v8  ;;  %v3171_v61 = vpop.f32.mrf.mxu1  ;;  %v1474_v8 = vsel %vm1451_vm7, %v1471_v49, %v1473_v1  ;;  %v4473_v49 = vld [vmem:[%s4955_s0 + $0x68] sm:$0xf] }
 0x152   :  { %v3221_v18 = vpop.f32.mrf.mxu0 }
 0x153   :  { %v549_v10 = vpop.f32.mrf.mxu1  ;;  %3381 = vmatmul.mubr.msk.bf16.gmra.mxu1 %vm213_vm4, %v1472_v55  ;;  %v1705_v18 = vld [vmem:[%s4955_s0 + $0x6c] sm:$0x3] }
 0x154   :  { %v751_v48 = vpop.f32.mrf.mxu0  ;;  %3431 = vmatmul.mubr.msk.bf16.gmra.mxu0 %vm213_vm4, %v1791_v13  ;;  %3384 = vmatprep.mubr.msk.bf16.mxu1 %vm3610_vm2, %v3608_v0  ;;  %v550_v58 = vadd.f32 %v549_v10, %v4152_v37  ;;  %v1475_v37 = vrot.slane %v4176_v54, 2  ;;  %v2851_v54 = vcombine.low %v4473_v49, %v1705_v18 }
 0x155   :  { %v4440_v28 = vadd.f32 %v751_v48, %v542_v22  ;;  %3434 = vmatprep.mubr.msk.bf16.mxu0 %vm3610_vm2, %v3608_v0  ;;  %v3174_v6 = vpop.f32.mrf.mxu1 }
 0x156   :  { %v3224_v30 = vpop.f32.mrf.mxu0  ;;  %v1476_v6 = vsel %vm1451_vm7, %v1473_v1, %v1475_v37 }
 0x157   :  { %v552_v39 = vpop.f32.mrf.mxu1  ;;  %v1795_v30 = vsel %vm1451_vm7, %v1792_v5, %v1794_v42  ;;  %v1796_v5 = vrot.slane %v2851_v54, 2 }
 0x158   :  { %v754_v47 = vpop.f32.mrf.mxu0  ;;  %v553_v55 = vadd.f32 %v552_v39, %v4173_v52  ;;  %v2009_v39 = vshrl.u32 %v4236_v2, 16 }
 0x159   :  { %v4450_v7 = vadd.f32 %v754_v47, %v545_v32  ;;  %v3175_v33 = vpop.f32.mrf.mxu1 }
 0x15a   :  { %v3225_v50 = vpop.f32.mrf.mxu0  ;;  %v2017_v33 = vshrl.u32 %v4241_v44, 16 }
 0x15b   :  { %v557_v20 = vpop.f32.mrf.mxu1  ;;  %3385 = vmatmul.mubr.msk.bf16.gmra.mxu1 %vm213_vm4, %v1474_v8 }
 0x15c   :  { %v759_v41 = vpop.f32.mrf.mxu0  ;;  %3435 = vmatmul.mubr.msk.bf16.gmra.mxu0 %vm213_vm4, %v1793_v45  ;;  %3388 = vmatprep.mubr.msk.bf16.mxu1 %vm3610_vm2, %v3608_v0  ;;  %v558_v47 = vadd.f32 %v557_v20, %v4182_v11  ;;  %v2012_v11 = vshll.u32 %v4236_v2, 16 }
 0x15d   :  { %v4461_v56 = vadd.f32 %v759_v41, %v550_v58  ;;  %3438 = vmatprep.mubr.msk.bf16.mxu0 %vm3610_vm2, %v3608_v0  ;;  %v3178_v22 = vpop.f32.mrf.mxu1  ;;  %v2020_v41 = vshll.u32 %v4241_v44, 16 }
 0x15e   :  { %v3228_v13 = vpop.f32.mrf.mxu0  ;;  %v2011_v22 = vrot.slane %v2009_v39, 2 }
 0x15f   :  { %v560_v48 = vpop.f32.mrf.mxu1  ;;  %v2022_v54 = vrot.slane %v2020_v41, 3 }
 0x160   :  { %v762_v61 = vpop.f32.mrf.mxu0 }
 0x161   :  { %v4479_v10 = vadd.f32 %v762_v61, %v553_v55  ;;  %v3179_v45 = vpop.f32.mrf.mxu1  ;;  %v1797_v55 = vsel %vm1451_vm7, %v1794_v42, %v1796_v5  ;;  %v2026_v42 = vshrl.u32 %v4268_v27, 16 }
 0x162   :  { %v3229_v32 = vpop.f32.mrf.mxu0 }
 0x163   :  { %v992_v52 = vpop.f32.mrf.mxu1  ;;  %3389 = vmatmul.mubr.msk.bf16.gmra.mxu1 %vm213_vm4, %v1476_v6  ;;  %v2028_v41 = vrot.slane %v2026_v42, 2 }
 0x164   :  { %v767_v50 = vpop.f32.mrf.mxu0  ;;  %3439 = vmatmul.mubr.msk.bf16.gmra.mxu0 %vm213_vm4, %v1795_v30  ;;  %v1094_v58 = vadd.f32 %v992_v52, %v4213_v16  ;;  %3392 = vmatprep.mubr.msk.bf16.mxu1 %vm3610_vm2, %v3608_v0  ;;  %v2014_v16 = vrot.slane %v2012_v11, 3  ;;  %v2019_v30 = vrot.slane %v2017_v33, 2 }
 0x165   :  { %v4486_v8 = vadd.f32 %v767_v50, %v558_v47  ;;  %3442 = vmatprep.mubr.msk.bf16.mxu0 %vm3610_vm2, %v3608_v0  ;;  %v3238_v20 = vpop.f32.mrf.mxu1 }
 0x166   :  { %v3232_v1 = vpop.f32.mrf.mxu0  ;;  %v2015_v52 = vor.u32 %v2014_v16, %v2011_v22  ;;  %v2023_v39 = vor.u32 %v2022_v54, %v2019_v30 }
 0x167   :  { %v995_v18 = vpop.f32.mrf.mxu1 }
 0x168   :  { %v770_v13 = vpop.f32.mrf.mxu0  ;;  %v1095_v61 = vadd.f32 %v995_v18, %v4233_v40  ;;  %v2029_v40 = vshll.u32 %v4268_v27, 16 }
 0x169   :  { %v3239_v32 = vpop.f32.mrf.mxu1 }
 0x16a   :  { %v3233_v48 = vpop.f32.mrf.mxu0  ;;  %v2031_v20 = vrot.slane %v2029_v40, 3 }
 0x16b   :  { %v1000_v2 = vpop.f32.mrf.mxu1  ;;  %3393 = vmatmul.mubr.msk.bf16.gmra.mxu1 %vm213_vm4, %v1475_v37 }
 0x16c   :  { %v1318_v6 = vpop.f32.mrf.mxu0  ;;  %3443 = vmatmul.mubr.msk.bf16.gmra.mxu0 %vm213_vm4, %v1797_v55  ;;  %v1096_v45 = vadd.f32 %v1000_v2, %v4247_v12  ;;  %3452 = vmatprep.mubr.msk.bf16.mxu1 %vm3610_vm2, %v3608_v0  ;;  %v2024_v55 = vsel %vm2007_vm8, %v2015_v52, %v2023_v39 }
 0x16d   :  { %v4501_v47 = vadd.f32 %v1318_v6, %v1094_v58  ;;  %3446 = vmatprep.mubr.msk.bf16.mxu0 %vm3610_vm2, %v3608_v0  ;;  %v2327_v58 = vld [vmem:[%s4955_s0 + $0x8] sm:$0x8]  ;;  %v3242_v37 = vpop.f32.mrf.mxu1  ;;  %v2038_v6 = vshll.u32 %v4289_v63, 16 }
 0x16e   :  { %v3292_v50 = vpop.f32.mrf.mxu0  ;;  %v2881_v12 = vcombine.low %v2327_v58, %v4228_v15  ;;  %v2335_v15 = vrot.slane %v4241_v44, 3 }
 0x16f   :  { %v1003_v11 = vpop.f32.mrf.mxu1  ;;  %v2040_v37 = vrot.slane %v2038_v6, 3 }
 0x170   :  { %v1321_v1 = vpop.f32.mrf.mxu0  ;;  %v1097_v13 = vadd.f32 %v1003_v11, %v4261_v3  ;;  %v2334_v54 = vrot.slane %v2881_v12, 3  ;;  %v2337_v12 = vrot.slane %v4268_v27, 3 }
 0x171   :  { %v4514_v33 = vadd.f32 %v1321_v1, %v1095_v61  ;;  %v3243_v22 = vpop.f32.mrf.mxu1  ;;  %v2032_v61 = vor.u32 %v2031_v20, %v2028_v41 }
 0x172   :  { %v3293_v18 = vpop.f32.mrf.mxu0  ;;  %v2336_v50 = vsel %vm2333_vm9, %v2334_v54, %v2335_v15 }
 0x173   :  { %v1008_v16 = vpop.f32.mrf.mxu1  ;;  %3453 = vmatmul.mubr.msk.bf16.vlgmr.msra.gmra.mxu1 %vm213_vm4, %v2024_v55  ;;  %v2044_v18 = vshrl.u32 %v4310_v34, 16  ;;  %v2047_v55 = vshll.u32 %v4310_v34, 16 }
 0x174   :  { %v1326_v48 = vpop.f32.mrf.mxu0  ;;  %3447 = vmatmul.mubr.msk.bf16.gmra.mxu0 %vm213_vm4, %v1796_v5  ;;  %v1098_v3 = vadd.f32 %v1008_v16, %v4273_v46  ;;  %3456 = vmatprep.mubr.msk.bf16.mxu1 %vm3610_vm2, %v3608_v0  ;;  %v2035_v5 = vshrl.u32 %v4289_v63, 16  ;;  %v2033_v46 = vsel %vm2007_vm8, %v2023_v39, %v2032_v61 }
 0x175   :  { %v4520_v30 = vadd.f32 %v1326_v48, %v1096_v45  ;;  %3506 = vmatprep.mubr.msk.bf16.mxu0 %vm3610_vm2, %v3608_v0  ;;  %v3246_v2 = vpop.f32.mrf.mxu1  ;;  %v2049_v6 = vrot.slane %v2047_v55, 3 }
 0x176   :  { %v3296_v32 = vpop.f32.mrf.mxu0  ;;  %v2037_v58 = vrot.slane %v2035_v5, 2  ;;  %v2046_v5 = vrot.slane %v2044_v18, 2 }
 0x177   :  { %v1011_v40 = vpop.f32.mrf.mxu1 }
 0x178   :  { %v1329_v42 = vpop.f32.mrf.mxu0  ;;  %v1099_v44 = vadd.f32 %v1011_v40, %v4283_v57  ;;  %v2041_v39 = vor.u32 %v2040_v37, %v2037_v58 }
 0x179   :  { %v4531_v45 = vadd.f32 %v1329_v42, %v1097_v13  ;;  %v3247_v1 = vpop.f32.mrf.mxu1 }
 0x17a   :  { %v3297_v52 = vpop.f32.mrf.mxu0 }
 0x17b   :  { %v1016_v41 = vpop.f32.mrf.mxu1  ;;  %3457 = vmatmul.mubr.msk.bf16.gmra.mxu1 %vm213_vm4, %v2033_v46  ;;  %v2053_v52 = vshrl.u32 %v4331_v14, 16  ;;  %v2056_v46 = vshll.u32 %v4331_v14, 16 }
 0x17c   :  { %v1334_v11 = vpop.f32.mrf.mxu0  ;;  %3507 = vmatmul.mubr.msk.bf16.vlgmr.msra.gmra.mxu0 %vm213_vm4, %v2336_v50  ;;  %v1100_v57 = vadd.f32 %v1016_v41, %v4294_v24  ;;  %3460 = vmatprep.mubr.msk.bf16.mxu1 %vm3610_vm2, %v3608_v0  ;;  %v2042_v24 = vsel %vm2007_vm8, %v2032_v61, %v2041_v39  ;;  %v2050_v61 = vor.u32 %v2049_v6, %v2046_v5 }
 0x17d   :  { %v4537_v20 = vadd.f32 %v1334_v11, %v1098_v3  ;;  %3510 = vmatprep.mubr.msk.bf16.mxu0 %vm3610_vm2, %v3608_v0  ;;  %v3250_v22 = vpop.f32.mrf.mxu1  ;;  %v2338_v3 = vsel %vm2333_vm9, %v2335_v15, %v2337_v12  ;;  %v2339_v15 = vrot.slane %v4289_v63, 3  ;;  %v2058_v18 = vrot.slane %v2056_v46, 3 }
 0x17e   :  { %v3300_v13 = vpop.f32.mrf.mxu0 }
 0x17f   :  { %v1019_v16 = vpop.f32.mrf.mxu1  ;;  %v2340_v41 = vsel %vm2333_vm9, %v2337_v12, %v2339_v15  ;;  %v2055_v13 = vrot.slane %v2053_v52, 2  ;;  %v2341_v12 = vrot.slane %v4310_v34, 3 }
 0x180   :  { %v1337_v48 = vpop.f32.mrf.mxu0  ;;  %v1101_v27 = vadd.f32 %v1019_v16, %v4304_v31 }
 0x181   :  { %v4548_v54 = vadd.f32 %v1337_v48, %v1099_v44  ;;  %v3251_v2 = vpop.f32.mrf.mxu1 }
 0x182   :  { %v3301_v32 = vpop.f32.mrf.mxu0 }
 0x183   :  { %v1024_v40 = vpop.f32.mrf.mxu1  ;;  %3461 = vmatmul.mubr.msk.bf16.gmra.mxu1 %vm213_vm4, %v2042_v24  ;;  %v2065_v32 = vshll.u32 %v4352_v62, 16 }
 0x184   :  { %v1342_v42 = vpop.f32.mrf.mxu0  ;;  %3511 = vmatmul.mubr.msk.bf16.gmra.mxu0 %vm213_vm4, %v2338_v3  ;;  %v1102_v31 = vadd.f32 %v1024_v40, %v4315_v53  ;;  %3464 = vmatprep.mubr.msk.bf16.mxu1 %vm3610_vm2, %v3608_v0  ;;  %v2051_v53 = vsel %vm2007_vm8, %v2041_v39, %v2050_v61  ;;  %v2059_v39 = vor.u32 %v2058_v18, %v2055_v13 }
 0x185   :  { %v4554_v50 = vadd.f32 %v1342_v42, %v1100_v57  ;;  %3514 = vmatprep.mubr.msk.bf16.mxu0 %vm3610_vm2, %v3608_v0  ;;  %v3254_v58 = vpop.f32.mrf.mxu1  ;;  %v2342_v42 = vsel %vm2333_vm9, %v2339_v15, %v2341_v12  ;;  %v2343_v15 = vrot.slane %v4331_v14, 3 }
 0x186   :  { %v3304_v44 = vpop.f32.mrf.mxu0 }
 0x187   :  { %v1027_v1 = vpop.f32.mrf.mxu1  ;;  %v2067_v44 = vrot.slane %v2065_v32, 3 }
 0x188   :  { %v1345_v37 = vpop.f32.mrf.mxu0  ;;  %v1103_v63 = vadd.f32 %v1027_v1, %v4325_v59 }
 0x189   :  { %v4565_v11 = vadd.f32 %v1345_v37, %v1101_v27  ;;  %v3255_v55 = vpop.f32.mrf.mxu1  ;;  %v2062_v27 = vshrl.u32 %v4352_v62, 16 }
 0x18a   :  { %v3305_v57 = vpop.f32.mrf.mxu0  ;;  %v2344_v55 = vsel %vm2333_vm9, %v2341_v12, %v2343_v15  ;;  %v2345_v12 = vrot.slane %v4352_v62, 3 }
 0x18b   :  { %v1032_v48 = vpop.f32.mrf.mxu1  ;;  %3465 = vmatmul.mubr.msk.bf16.gmra.mxu1 %vm213_vm4, %v2051_v53 }
 0x18c   :  { %v1350_v22 = vpop.f32.mrf.mxu0  ;;  %3515 = vmatmul.mubr.msk.bf16.gmra.mxu0 %vm213_vm4, %v2340_v41  ;;  %v1104_v59 = vadd.f32 %v1032_v48, %v4336_v21  ;;  %3468 = vmatprep.mubr.msk.bf16.mxu1 %vm3610_vm2, %v3608_v0  ;;  %v2060_v21 = vsel %vm2007_vm8, %v2050_v61, %v2059_v39  ;;  %v2071_v41 = vshrl.u32 %v4372_v17, 16 }
 0x18d   :  { %v4571_v16 = vadd.f32 %v1350_v22, %v1102_v31  ;;  %3518 = vmatprep.mubr.msk.bf16.mxu0 %vm3610_vm2, %v3608_v0  ;;  %v3258_v24 = vpop.f32.mrf.mxu1  ;;  %v2064_v31 = vrot.slane %v2062_v27, 2 }
 0x18e   :  { %v3308_v3 = vpop.f32.mrf.mxu0  ;;  %v2073_v48 = vrot.slane %v2071_v41, 2 }
 0x18f   :  { %v1035_v6 = vpop.f32.mrf.mxu1  ;;  %v2068_v61 = vor.u32 %v2067_v44, %v2064_v31  ;;  %v2346_v44 = vsel %vm2333_vm9, %v2343_v15, %v2345_v12  ;;  %v2347_v15 = vrot.slane %v4372_v17, 3 }
 0x190   :  { %v1353_v5 = vpop.f32.mrf.mxu0  ;;  %v1105_v34 = vadd.f32 %v1035_v6, %v4346_v38  ;;  %v2080_v6 = vshrl.u32 %v4393_v25, 16 }
 0x191   :  { %v4582_v2 = vadd.f32 %v1353_v5, %v1103_v63  ;;  %v3259_v52 = vpop.f32.mrf.mxu1  ;;  %v2074_v63 = vshll.u32 %v4372_v17, 16 }
 0x192   :  { %v3309_v40 = vpop.f32.mrf.mxu0 }
 0x193   :  { %v1040_v58 = vpop.f32.mrf.mxu1  ;;  %3469 = vmatmul.mubr.msk.bf16.gmra.mxu1 %vm213_vm4, %v2060_v21 }
 0x194   :  { %v1358_v46 = vpop.f32.mrf.mxu0  ;;  %3519 = vmatmul.mubr.msk.bf16.gmra.mxu0 %vm213_vm4, %v2342_v42  ;;  %v1106_v38 = vadd.f32 %v1040_v58, %v4357_v60  ;;  %3472 = vmatprep.mubr.msk.bf16.mxu1 %vm3610_vm2, %v3608_v0  ;;  %v2069_v60 = vsel %vm2007_vm8, %v2059_v39, %v2068_v61  ;;  %v2083_v42 = vshll.u32 %v4393_v25, 16 }
 0x195   :  { %v4588_v37 = vadd.f32 %v1358_v46, %v1104_v59  ;;  %3522 = vmatprep.mubr.msk.bf16.mxu0 %vm3610_vm2, %v3608_v0  ;;  %v3262_v57 = vpop.f32.mrf.mxu1  ;;  %v2076_v59 = vrot.slane %v2074_v63, 3  ;;  %v2082_v46 = vrot.slane %v2080_v6, 2 }
 0x196   :  { %v3312_v1 = vpop.f32.mrf.mxu0  ;;  %v2085_v58 = vrot.slane %v2083_v42, 3 }
 0x197   :  { %v1043_v13 = vpop.f32.mrf.mxu1  ;;  %v2077_v39 = vor.u32 %v2076_v59, %v2073_v48  ;;  %v2348_v48 = vsel %vm2333_vm9, %v2345_v12, %v2347_v15  ;;  %v2349_v12 = vrot.slane %v4393_v25, 3 }
 0x198   :  { %v1361_v53 = vpop.f32.mrf.mxu0  ;;  %v1107_v14 = vadd.f32 %v1043_v13, %v4366_v36  ;;  %v2092_v13 = vshll.u32 %v4414_v4, 16 }
 0x199   :  { %v4599_v18 = vadd.f32 %v1361_v53, %v1105_v34  ;;  %v3263_v3 = vpop.f32.mrf.mxu1  ;;  %v2089_v53 = vshrl.u32 %v4414_v4, 16 }
 0x19a   :  { %v3313_v22 = vpop.f32.mrf.mxu0 }
 0x19b   :  { %v1048_v32 = vpop.f32.mrf.mxu1  ;;  %3473 = vmatmul.mubr.msk.bf16.gmra.mxu1 %vm213_vm4, %v2069_v60  ;;  %v2091_v3 = vrot.slane %v2089_v53, 2 }
 0x19c   :  { %v1366_v27 = vpop.f32.mrf.mxu0  ;;  %3523 = vmatmul.mubr.msk.bf16.gmra.mxu0 %vm213_vm4, %v2344_v55  ;;  %v1108_v36 = vadd.f32 %v1048_v32, %v4377_v35  ;;  %3476 = vmatprep.mubr.msk.bf16.mxu1 %vm3610_vm2, %v3608_v0  ;;  %v2078_v35 = vsel %vm2007_vm8, %v2068_v61, %v2077_v39  ;;  %v2086_v61 = vor.u32 %v2085_v58, %v2082_v46 }
 0x19d   :  { %v4605_v24 = vadd.f32 %v1366_v27, %v1106_v38  ;;  %3526 = vmatprep.mubr.msk.bf16.mxu0 %vm3610_vm2, %v3608_v0  ;;  %v3266_v34 = vpop.f32.mrf.mxu1  ;;  %v2094_v27 = vrot.slane %v2092_v13, 3 }
 0x19e   :  { %v3316_v5 = vpop.f32.mrf.mxu0  ;;  %v2098_v34 = vshrl.u32 %v4435_v19, 16 }
 0x19f   :  { %v1051_v21 = vpop.f32.mrf.mxu1 }
 0x1a0   :  { %v1369_v40 = vpop.f32.mrf.mxu0  ;;  %v1109_v62 = vadd.f32 %v1051_v21, %v4387_v23  ;;  %v2100_v58 = vrot.slane %v2098_v34, 2 }
 0x1a1   :  { %v4616_v31 = vadd.f32 %v1369_v40, %v1107_v14  ;;  %v3267_v38 = vpop.f32.mrf.mxu1  ;;  %v2101_v40 = vshll.u32 %v4435_v19, 16 }
 0x1a2   :  { %v3317_v52 = vpop.f32.mrf.mxu0 }
 0x1a3   :  { %v1056_v41 = vpop.f32.mrf.mxu1  ;;  %3477 = vmatmul.mubr.msk.bf16.gmra.mxu1 %vm213_vm4, %v2078_v35  ;;  %v2350_v35 = vsel %vm2333_vm9, %v2347_v15, %v2349_v12  ;;  %v2103_v38 = vrot.slane %v2101_v40, 3  ;;  %v2351_v15 = vrot.slane %v4414_v4, 3 }
 0x1a4   :  { %v1374_v1 = vpop.f32.mrf.mxu0  ;;  %3527 = vmatmul.mubr.msk.bf16.gmra.mxu0 %vm213_vm4, %v2346_v44  ;;  %v1110_v23 = vadd.f32 %v1056_v41, %v4398_v51  ;;  %3480 = vmatprep.mubr.msk.bf16.mxu1 %vm3610_vm2, %v3608_v0  ;;  %v2087_v51 = vsel %vm2007_vm8, %v2077_v39, %v2086_v61  ;;  %v2095_v39 = vor.u32 %v2094_v27, %v2091_v3 }
 0x1a5   :  { %v4622_v63 = vadd.f32 %v1374_v1, %v1108_v36  ;;  %3530 = vmatprep.mubr.msk.bf16.mxu0 %vm3610_vm2, %v3608_v0  ;;  %v3270_v55 = vpop.f32.mrf.mxu1  ;;  %v2104_v13 = vor.u32 %v2103_v38, %v2100_v58 }
 0x1a6   :  { %v3320_v57 = vpop.f32.mrf.mxu0  ;;  %v2107_v55 = vshrl.u32 %v4456_v43, 16 }
 0x1a7   :  { %v1059_v22 = vpop.f32.mrf.mxu1  ;;  %v2105_v27 = vsel %vm2007_vm8, %v2095_v39, %v2104_v13 }
 0x1a8   :  { %v1377_v14 = vpop.f32.mrf.mxu0  ;;  %v1111_v17 = vadd.f32 %v1059_v22, %v4408_v26 }
 0x1a9   :  { %v4633_v60 = vadd.f32 %v1377_v14, %v1109_v62  ;;  %v3271_v32 = vpop.f32.mrf.mxu1  ;;  %v2110_v14 = vshll.u32 %v4456_v43, 16 }
 0x1aa   :  { %v3321_v59 = vpop.f32.mrf.mxu0  ;;  %v2109_v32 = vrot.slane %v2107_v55, 2 }
 0x1ab   :  { %v1064_v5 = vpop.f32.mrf.mxu1  ;;  %3481 = vmatmul.mubr.msk.bf16.gmra.mxu1 %vm213_vm4, %v2087_v51  ;;  %v2352_v51 = vsel %vm2333_vm9, %v2349_v12, %v2351_v15 }
 0x1ac   :  { %v1382_v36 = vpop.f32.mrf.mxu0  ;;  %3531 = vmatmul.mubr.msk.bf16.gmra.mxu0 %vm213_vm4, %v2348_v48  ;;  %v1112_v26 = vadd.f32 %v1064_v5, %v4419_v9  ;;  %3484 = vmatprep.mubr.msk.bf16.mxu1 %vm3610_vm2, %v3608_v0  ;;  %v2096_v9 = vsel %vm2007_vm8, %v2086_v61, %v2095_v39 }
 0x1ad   :  { %v4639_v6 = vadd.f32 %v1382_v36, %v1110_v23  ;;  %3534 = vmatprep.mubr.msk.bf16.mxu0 %vm3610_vm2, %v3608_v0  ;;  %v3274_v21 = vpop.f32.mrf.mxu1  ;;  %v2112_v36 = vrot.slane %v2110_v14, 3 }
 0x1ae   :  { %v3324_v42 = vpop.f32.mrf.mxu0 }
 0x1af   :  { %v1067_v62 = vpop.f32.mrf.mxu1  ;;  %v2113_v39 = vor.u32 %v2112_v36, %v2109_v32 }
 0x1b0   :  { %v1385_v44 = vpop.f32.mrf.mxu0  ;;  %v1113_v25 = vadd.f32 %v1067_v62, %v4429_v29  ;;  %v2001_v29 = vld [vmem:[%s4955_s0 + $0x6c] sm:$0x7] }
 0x1b1   :  { %v4650_v52 = vadd.f32 %v1385_v44, %v1111_v17  ;;  %v3275_v1 = vpop.f32.mrf.mxu1  ;;  %v4671_v17 = vcombine.low %v4473_v49, %v2001_v29  ;;  %v2353_v49 = vrot.slane %v4435_v19, 3 }
 0x1b2   :  { %v3325_v46 = vpop.f32.mrf.mxu0 }
 0x1b3   :  { %v1072_v23 = vpop.f32.mrf.mxu1  ;;  %3485 = vmatmul.mubr.msk.bf16.gmra.mxu1 %vm213_vm4, %v2096_v9  ;;  %v2116_v40 = vshrl.u32 %v4671_v17, 16  ;;  %v2119_v21 = vshll.u32 %v4671_v17, 16  ;;  %v2354_v46 = vsel %vm2333_vm9, %v2351_v15, %v2353_v49  ;;  %v2355_v15 = vrot.slane %v4456_v43, 3 }
 0x1b4   :  { %v1390_v41 = vpop.f32.mrf.mxu0  ;;  %3535 = vmatmul.mubr.msk.bf16.gmra.mxu0 %vm213_vm4, %v2350_v35  ;;  %v1114_v61 = vadd.f32 %v1072_v23, %v4440_v28  ;;  %3488 = vmatprep.mubr.msk.bf16.mxu1 %vm3610_vm2, %v3608_v0 }
 0x1b5   :  { %v4656_v57 = vadd.f32 %v1390_v41, %v1112_v26  ;;  %3538 = vmatprep.mubr.msk.bf16.mxu0 %vm3610_vm2, %v3608_v0  ;;  %v3278_v22 = vpop.f32.mrf.mxu1  ;;  %v2118_v58 = vrot.slane %v2116_v40, 2  ;;  %v2121_v38 = vrot.slane %v2119_v21, 3 }
 0x1b6   :  { %v3328_v53 = vpop.f32.mrf.mxu0 }
 0x1b7   :  { %v1075_v4 = vpop.f32.mrf.mxu1  ;;  %v2122_v53 = vor.u32 %v2121_v38, %v2118_v58 }
 0x1b8   :  { %v1393_v48 = vpop.f32.mrf.mxu0  ;;  %v1115_v28 = vadd.f32 %v1075_v4, %v4450_v7 }
 0x1b9   :  { %v4673_v59 = vadd.f32 %v1393_v48, %v1113_v25  ;;  %v3279_v5 = vpop.f32.mrf.mxu1  ;;  %v2356_v48 = vsel %vm2333_vm9, %v2353_v49, %v2355_v15 }
 0x1ba   :  { %v3329_v3 = vpop.f32.mrf.mxu0 }
 0x1bb   :  { %v1080_v42 = vpop.f32.mrf.mxu1  ;;  %3489 = vmatmul.mubr.msk.bf16.gmra.mxu1 %vm213_vm4, %v2105_v27  ;;  %v2357_v27 = vrot.slane %v4671_v17, 3 }
 0x1bc   :  { %v1398_v26 = vpop.f32.mrf.mxu0  ;;  %3539 = vmatmul.mubr.msk.bf16.gmra.mxu0 %vm213_vm4, %v2352_v51  ;;  %v1116_v7 = vadd.f32 %v1080_v42, %v4461_v56  ;;  %3492 = vmatprep.mubr.msk.bf16.mxu1 %vm3610_vm2, %v3608_v0  ;;  %v2114_v56 = vsel %vm2007_vm8, %v2104_v13, %v2113_v39  ;;  %v2123_v51 = vsel %vm2007_vm8, %v2113_v39, %v2122_v53 }
 0x1bd   :  { %v4679_v34 = vadd.f32 %v1398_v26, %v1114_v61  ;;  %3542 = vmatprep.mubr.msk.bf16.mxu0 %vm3610_vm2, %v3608_v0  ;;  %v3282_v44 = vpop.f32.mrf.mxu1  ;;  %v2358_v49 = vsel %vm2333_vm9, %v2355_v15, %v2357_v27 }
 0x1be   :  { %v3332_v12 = vpop.f32.mrf.mxu0 }
 0x1bf   :  { %v1083_v35 = vpop.f32.mrf.mxu1 }
 0x1c0   :  { %v1401_v62 = vpop.f32.mrf.mxu0  ;;  %v1117_v19 = vadd.f32 %v1083_v35, %v4479_v10 }
 0x1c1   :  { %v4690_v25 = vadd.f32 %v1401_v62, %v1115_v28  ;;  %v3283_v1 = vpop.f32.mrf.mxu1 }
 0x1c2   :  { %v3333_v9 = vpop.f32.mrf.mxu0 }
 0x1c3   :  { %v1088_v23 = vpop.f32.mrf.mxu1  ;;  %3493 = vmatmul.mubr.msk.bf16.gmra.mxu1 %vm213_vm4, %v2114_v56 }
 0x1c4   :  { %v1406_v41 = vpop.f32.mrf.mxu0  ;;  %3543 = vmatmul.mubr.msk.bf16.gmra.mxu0 %vm213_vm4, %v2354_v46  ;;  %v1118_v10 = vadd.f32 %v1088_v23, %v4486_v8  ;;  %3496 = vmatprep.mubr.msk.bf16.mxu1 %vm3610_vm2, %v3608_v0 }
 0x1c5   :  { %v4696_v29 = vadd.f32 %v1406_v41, %v1116_v7  ;;  %3546 = vmatprep.mubr.msk.bf16.mxu0 %vm3610_vm2, %v3608_v0  ;;  %v3286_v13 = vpop.f32.mrf.mxu1 }
 0x1c6   :  { %v3336_v61 = vpop.f32.mrf.mxu0 }
 0x1c7   :  { %v1091_v14 = vpop.f32.mrf.mxu1 }
 0x1c8   :  { %v1409_v55 = vpop.f32.mrf.mxu0 }
 0x1c9   :  { %v4705_v22 = vadd.f32 %v1409_v55, %v1117_v19  ;;  %v3287_v28 = vpop.f32.mrf.mxu1 }
 0x1ca   :  { %v3337_v4 = vpop.f32.mrf.mxu0 }
 0x1cb   :  { %v1553_v8 = vpop.f32.mrf.mxu1  ;;  %3497 = vmatmul.mubr.msk.bf16.gmra.mxu1 %vm213_vm4, %v2123_v51 }
 0x1cc   :  { %v1414_v3 = vpop.f32.mrf.mxu0  ;;  %3547 = vmatmul.mubr.msk.bf16.gmra.mxu0 %vm213_vm4, %v2356_v48  ;;  %v1655_v32 = vadd.f32 %v1553_v8, %v4501_v47  ;;  %3500 = vmatprep.mubr.msk.bf16.mxu1 %vm3610_vm2, %v3608_v0 }
 0x1cd   :  { %v4710_v43 = vadd.f32 %v1414_v3, %v1118_v10  ;;  %3550 = vmatprep.mubr.msk.bf16.mxu0 %vm3610_vm2, %v3608_v0  ;;  %v3346_v5 = vpop.f32.mrf.mxu1 }
 0x1ce   :  { %v3340_v36 = vpop.f32.mrf.mxu0 }
 0x1cf   :  { %v1556_v42 = vpop.f32.mrf.mxu1 }
 0x1d0   :  { %v1417_v26 = vpop.f32.mrf.mxu0  ;;  %v1656_v7 = vadd.f32 %v1556_v42, %v4514_v33 }
 0x1d1   :  { %v3347_v39 = vpop.f32.mrf.mxu1 }
 0x1d2   :  { %v3341_v12 = vpop.f32.mrf.mxu0 }
 0x1d3   :  { %v1561_v21 = vpop.f32.mrf.mxu1  ;;  %3501 = vmatmul.mubr.msk.bf16.gmra.mxu1 %vm213_vm4, %v2122_v53 }
 0x1d4   :  { %v1874_v40 = vpop.f32.mrf.mxu0  ;;  %3551 = vmatmul.mubr.msk.bf16.gmra.mxu0 %vm213_vm4, %v2358_v49  ;;  %v1657_v47 = vadd.f32 %v1561_v21, %v4520_v30 }
 0x1d5   :  { %v4722_v17 = vadd.f32 %v1874_v40, %v1655_v32  ;;  %3554 = vmatprep.mubr.msk.bf16.mxu0 %vm3610_vm2, %v3608_v0  ;;  %v3350_v62 = vpop.f32.mrf.mxu1 }
 0x1d6   :  { %v3400_v44 = vpop.f32.mrf.mxu0 }
 0x1d7   :  { %v1564_v46 = vpop.f32.mrf.mxu1 }
 0x1d8   :  { %v1877_v35 = vpop.f32.mrf.mxu0  ;;  %v1658_v19 = vadd.f32 %v1564_v46, %v4531_v45 }
 0x1d9   :  { %v4728_v33 = vadd.f32 %v1877_v35, %v1656_v7  ;;  %v3351_v56 = vpop.f32.mrf.mxu1 }
 0x1da   :  { %v3401_v9 = vpop.f32.mrf.mxu0 }
 0x1db   :  { %v1569_v38 = vpop.f32.mrf.mxu1 }
 0x1dc   :  { %v1882_v58 = vpop.f32.mrf.mxu0  ;;  %3555 = vmatmul.mubr.msk.bf16.gmra.mxu0 %vm213_vm4, %v2357_v27  ;;  %v1659_v0 = vadd.f32 %v1569_v38, %v4537_v20 }
 0x1dd   :  { %v4732_v1 = vadd.f32 %v1882_v58, %v1657_v47  ;;  %v3354_v30 = vpop.f32.mrf.mxu1 }
 0x1de   :  { %v3404_v41 = vpop.f32.mrf.mxu0 }
 0x1df   :  { %v1572_v15 = vpop.f32.mrf.mxu1 }
 0x1e0   :  { %v1885_v23 = vpop.f32.mrf.mxu0  ;;  %v1660_v61 = vadd.f32 %v1572_v15, %v4548_v54 }
 0x1e1   :  { %v4735_v10 = vadd.f32 %v1885_v23, %v1658_v19  ;;  %v3355_v45 = vpop.f32.mrf.mxu1 }
 0x1e2   :  { %v3405_v53 = vpop.f32.mrf.mxu0 }
 0x1e3   :  { %v1577_v55 = vpop.f32.mrf.mxu1 }
 0x1e4   :  { %v1890_v13 = vpop.f32.mrf.mxu0  ;;  %v1661_v48 = vadd.f32 %v1577_v55, %v4554_v50 }
 0x1e5   :  { %v4738_v14 = vadd.f32 %v1890_v13, %v1659_v0  ;;  %v3358_v51 = vpop.f32.mrf.mxu1 }
 0x1e6   :  { %v3408_v4 = vpop.f32.mrf.mxu0 }
 0x1e7   :  { %v1580_v20 = vpop.f32.mrf.mxu1 }
 0x1e8   :  { %v1893_v28 = vpop.f32.mrf.mxu0  ;;  %v1662_v8 = vadd.f32 %v1580_v20, %v4565_v11 }
 0x1e9   :  { %v4741_v3 = vadd.f32 %v1893_v28, %v1660_v61  ;;  %v3359_v32 = vpop.f32.mrf.mxu1 }
 0x1ea   :  { %v3409_v27 = vpop.f32.mrf.mxu0 }
 0x1eb   :  { %v1585_v54 = vpop.f32.mrf.mxu1 }
 0x1ec   :  { %v1898_v36 = vpop.f32.mrf.mxu0  ;;  %v1663_v26 = vadd.f32 %v1585_v54, %v4571_v16 }
 0x1ed   :  { %v4744_v5 = vadd.f32 %v1898_v36, %v1661_v48  ;;  %v3362_v49 = vpop.f32.mrf.mxu1 }
 0x1ee   :  { %v3412_v42 = vpop.f32.mrf.mxu0 }
 0x1ef   :  { %v1588_v50 = vpop.f32.mrf.mxu1 }
 0x1f0   :  { %v1901_v7 = vpop.f32.mrf.mxu0  ;;  %v1664_v39 = vadd.f32 %v1588_v50, %v4582_v2 }
 0x1f1   :  { %v4747_v12 = vadd.f32 %v1901_v7, %v1662_v8  ;;  %v3363_v21 = vpop.f32.mrf.mxu1 }
 0x1f2   :  { %v3413_v40 = vpop.f32.mrf.mxu0 }
 0x1f3   :  { %v1593_v11 = vpop.f32.mrf.mxu1 }
 0x1f4   :  { %v1906_v47 = vpop.f32.mrf.mxu0  ;;  %v1665_v62 = vadd.f32 %v1593_v11, %v4588_v37 }
 0x1f5   :  { %v4750_v44 = vadd.f32 %v1906_v47, %v1663_v26  ;;  %v3366_v46 = vpop.f32.mrf.mxu1 }
 0x1f6   :  { %v3416_v35 = vpop.f32.mrf.mxu0 }
 0x1f7   :  { %v1596_v16 = vpop.f32.mrf.mxu1 }
 0x1f8   :  { %v1909_v19 = vpop.f32.mrf.mxu0  ;;  %v1666_v56 = vadd.f32 %v1596_v16, %v4599_v18 }
 0x1f9   :  { %v4753_v9 = vadd.f32 %v1909_v19, %v1664_v39  ;;  %v3367_v38 = vpop.f32.mrf.mxu1 }
 0x1fa   :  { %v3417_v58 = vpop.f32.mrf.mxu0 }
 0x1fb   :  { %v1601_v2 = vpop.f32.mrf.mxu1 }
 0x1fc   :  { %v1914_v0 = vpop.f32.mrf.mxu0  ;;  %v1667_v30 = vadd.f32 %v1601_v2, %v4605_v24 }
 0x1fd   :  { %v4756_v41 = vadd.f32 %v1914_v0, %v1665_v62  ;;  %v3370_v15 = vpop.f32.mrf.mxu1 }
 0x1fe   :  { %v3420_v23 = vpop.f32.mrf.mxu0 }
 0x1ff   :  { %v1604_v37 = vpop.f32.mrf.mxu1 }
 0x200   :  { %v1917_v61 = vpop.f32.mrf.mxu0  ;;  %v1668_v45 = vadd.f32 %v1604_v37, %v4616_v31 }
 0x201   :  { %v4759_v53 = vadd.f32 %v1917_v61, %v1666_v56  ;;  %v3371_v55 = vpop.f32.mrf.mxu1 }
 0x202   :  { %v3421_v13 = vpop.f32.mrf.mxu0 }
 0x203   :  { %v1609_v18 = vpop.f32.mrf.mxu1 }
 0x204   :  { %v1922_v48 = vpop.f32.mrf.mxu0  ;;  %v1669_v51 = vadd.f32 %v1609_v18, %v4622_v63 }
 0x205   :  { %v4762_v4 = vadd.f32 %v1922_v48, %v1667_v30  ;;  %v3374_v20 = vpop.f32.mrf.mxu1 }
 0x206   :  { %v3424_v28 = vpop.f32.mrf.mxu0 }
 0x207   :  { %v1612_v24 = vpop.f32.mrf.mxu1 }
 0x208   :  { %v1925_v8 = vpop.f32.mrf.mxu0  ;;  %v1670_v32 = vadd.f32 %v1612_v24, %v4633_v60 }
 0x209   :  { %v4765_v27 = vadd.f32 %v1925_v8, %v1668_v45  ;;  %v3375_v54 = vpop.f32.mrf.mxu1 }
 0x20a   :  { %v3425_v36 = vpop.f32.mrf.mxu0 }
 0x20b   :  { %v1617_v31 = vpop.f32.mrf.mxu1 }
 0x20c   :  { %v1930_v26 = vpop.f32.mrf.mxu0  ;;  %v1671_v49 = vadd.f32 %v1617_v31, %v4639_v6 }
 0x20d   :  { %v4768_v42 = vadd.f32 %v1930_v26, %v1669_v51  ;;  %v3378_v50 = vpop.f32.mrf.mxu1 }
 0x20e   :  { %v3428_v7 = vpop.f32.mrf.mxu0 }
 0x20f   :  { %v1620_v63 = vpop.f32.mrf.mxu1 }
 0x210   :  { %v1933_v39 = vpop.f32.mrf.mxu0  ;;  %v1672_v21 = vadd.f32 %v1620_v63, %v4650_v52 }
 0x211   :  { %v4771_v40 = vadd.f32 %v1933_v39, %v1670_v32  ;;  %v3379_v11 = vpop.f32.mrf.mxu1 }
 0x212   :  { %v3429_v47 = vpop.f32.mrf.mxu0 }
 0x213   :  { %v1625_v60 = vpop.f32.mrf.mxu1 }
 0x214   :  { %v1938_v62 = vpop.f32.mrf.mxu0  ;;  %v1673_v46 = vadd.f32 %v1625_v60, %v4656_v57 }
 0x215   :  { %v4774_v35 = vadd.f32 %v1938_v62, %v1671_v49  ;;  %v3382_v16 = vpop.f32.mrf.mxu1 }
 0x216   :  { %v3432_v19 = vpop.f32.mrf.mxu0 }
 0x217   :  { %v1628_v6 = vpop.f32.mrf.mxu1 }
 0x218   :  { %v1941_v56 = vpop.f32.mrf.mxu0  ;;  %v1674_v38 = vadd.f32 %v1628_v6, %v4673_v59 }
 0x219   :  { %v4777_v58 = vadd.f32 %v1941_v56, %v1672_v21  ;;  %v3383_v2 = vpop.f32.mrf.mxu1 }
 0x21a   :  { %v3433_v0 = vpop.f32.mrf.mxu0 }
 0x21b   :  { %v1633_v52 = vpop.f32.mrf.mxu1 }
 0x21c   :  { %v1946_v30 = vpop.f32.mrf.mxu0  ;;  %v1675_v15 = vadd.f32 %v1633_v52, %v4679_v34 }
 0x21d   :  { %v4780_v23 = vadd.f32 %v1946_v30, %v1673_v46  ;;  %v3386_v37 = vpop.f32.mrf.mxu1  ;;  %v4803_v30 = vld [vmem:[%s4956_s2] ss:$0 sm:$0xff] }
 0x21e   :  { %v3436_v61 = vpop.f32.mrf.mxu0 }
 0x21f   :  { %v1636_v57 = vpop.f32.mrf.mxu1 }
 0x220   :  { %v1949_v45 = vpop.f32.mrf.mxu0  ;;  %v1676_v55 = vadd.f32 %v1636_v57, %v4690_v25 }
 0x221   :  { %v4783_v13 = vadd.f32 %v1949_v45, %v1674_v38  ;;  %v3387_v18 = vpop.f32.mrf.mxu1 }
 0x222   :  { %v3437_v48 = vpop.f32.mrf.mxu0 }
 0x223   :  { %v1641_v59 = vpop.f32.mrf.mxu1 }
 0x224   :  { %v1954_v51 = vpop.f32.mrf.mxu0  ;;  %v1677_v20 = vadd.f32 %v1641_v59, %v4696_v29 }
 0x225   :  { %v4786_v28 = vadd.f32 %v1954_v51, %v1675_v15  ;;  %v3390_v24 = vpop.f32.mrf.mxu1 }
 0x226   :  { %v3440_v8 = vpop.f32.mrf.mxu0 }
 0x227   :  { %v1644_v34 = vpop.f32.mrf.mxu1 }
 0x228   :  { %v1957_v32 = vpop.f32.mrf.mxu0  ;;  %v1678_v54 = vadd.f32 %v1644_v34, %v4705_v22 }
 0x229   :  { %v4789_v36 = vadd.f32 %v1957_v32, %v1676_v55  ;;  %v3391_v31 = vpop.f32.mrf.mxu1 }
 0x22a   :  { %v3441_v26 = vpop.f32.mrf.mxu0 }
 0x22b   :  { %v1649_v25 = vpop.f32.mrf.mxu1 }
 0x22c   :  { %v1962_v49 = vpop.f32.mrf.mxu0  ;;  %v1679_v50 = vadd.f32 %v1649_v25, %v4710_v43 }
 0x22d   :  { %v4792_v7 = vadd.f32 %v1962_v49, %v1677_v20  ;;  %v3394_v63 = vpop.f32.mrf.mxu1 }
 0x22e   :  { %v3444_v39 = vpop.f32.mrf.mxu0 }
 0x22f   :  { %v1652_v29 = vpop.f32.mrf.mxu1 }
 0x230   :  { %v1965_v21 = vpop.f32.mrf.mxu0 }
 0x231   :  { %v4795_v47 = vadd.f32 %v1965_v21, %v1678_v54  ;;  %v3395_v62 = vpop.f32.mrf.mxu1 }
 0x232   :  { %v3445_v11 = vpop.f32.mrf.mxu0 }
 0x233   :  { %v2200_v22 = vpop.f32.mrf.mxu1 }
 0x234   :  { %v1970_v60 = vpop.f32.mrf.mxu0  ;;  %v2302_v0 = vadd.f32 %v2200_v22, %v4722_v17 }
 0x235   :  { %v4797_v46 = vadd.f32 %v1970_v60, %v1679_v50  ;;  %v3454_v16 = vpop.f32.mrf.mxu1 }
 0x236   :  { %v3448_v19 = vpop.f32.mrf.mxu0 }
 0x237   :  { %v2203_v6 = vpop.f32.mrf.mxu1 }
 0x238   :  { %v1973_v56 = vpop.f32.mrf.mxu0  ;;  %v2303_v37 = vadd.f32 %v2203_v6, %v4728_v33 }
 0x239   :  { %v3455_v43 = vpop.f32.mrf.mxu1 }
 0x23a   :  { %v3449_v38 = vpop.f32.mrf.mxu0 }
 0x23b   :  { %v2208_v52 = vpop.f32.mrf.mxu1 }
 0x23c   :  { %v2435_v2 = vpop.f32.mrf.mxu0  ;;  %v2304_v59 = vadd.f32 %v2208_v52, %v4732_v1 }
 0x23d   :  { %v2537_v15 = vadd.f32 %v2435_v2, %v2302_v0  ;;  %v3458_v57 = vpop.f32.mrf.mxu1 }
 0x23e   :  { %v3508_v61 = vpop.f32.mrf.mxu0 }
 0x23f   :  { %v2569_v45 = vadd.f32 %v4803_v30, %v2537_v15  ;;  %v2211_v18 = vpop.f32.mrf.mxu1 }
 0x240   :  { %v2438_v55 = vpop.f32.mrf.mxu0  ;;  %v2305_v26 = vadd.f32 %v2211_v18, %v4735_v10 }
 0x241   :  { %v2921_v48 = vpack.c.bf16 %v2569_v45, %v2569_v45  ;;  %v2538_v17 = vadd.f32 %v2438_v55, %v2303_v37  ;;  %v3459_v8 = vpop.f32.mrf.mxu1 }
 0x242   :  { %v3509_v51 = vpop.f32.mrf.mxu0 }
 0x243   :  { %2696 = vst.msk [vmem:[%s4957_s3] sm:$0xf] %vm2695_vm10, %v2921_v48  ;;  %v2570_v20 = vadd.f32 %v4803_v30, %v2538_v17  ;;  %v2216_v32 = vpop.f32.mrf.mxu1 }
 0x244   :  { %v2443_v33 = vpop.f32.mrf.mxu0  ;;  %v2306_v21 = vadd.f32 %v2216_v32, %v4738_v14 }
 0x245   :  { %v2922_v24 = vpack.c.bf16 %v2570_v20, %v2570_v20  ;;  %v2539_v34 = vadd.f32 %v2443_v33, %v2304_v59  ;;  %v3462_v31 = vpop.f32.mrf.mxu1 }
 0x246   :  { %v3512_v54 = vpop.f32.mrf.mxu0 }
 0x247   :  { %2697 = vst.msk [vmem:[%s4957_s3 + $0x4] sm:$0xf] %vm2695_vm10, %v2922_v24  ;;  %v2571_v1 = vadd.f32 %v4803_v30, %v2539_v34  ;;  %v2219_v50 = vpop.f32.mrf.mxu1 }
 0x248   :  { %v2446_v49 = vpop.f32.mrf.mxu0  ;;  %v2307_v16 = vadd.f32 %v2219_v50, %v4741_v3 }
 0x249   :  { %v2923_v25 = vpack.c.bf16 %v2571_v1, %v2571_v1  ;;  %v2540_v39 = vadd.f32 %v2446_v49, %v2305_v26  ;;  %v3463_v29 = vpop.f32.mrf.mxu1 }
 0x24a   :  { %v3513_v63 = vpop.f32.mrf.mxu0 }
 0x24b   :  { %2698 = vst.msk [vmem:[%s4957_s3 + $0x8] sm:$0xf] %vm2695_vm10, %v2923_v25  ;;  %v2572_v10 = vadd.f32 %v4803_v30, %v2540_v39  ;;  %v2224_v60 = vpop.f32.mrf.mxu1 }
 0x24c   :  { %v2451_v11 = vpop.f32.mrf.mxu0  ;;  %v2308_v52 = vadd.f32 %v2224_v60, %v4744_v5 }
 0x24d   :  { %v2924_v62 = vpack.c.bf16 %v2572_v10, %v2572_v10  ;;  %v2541_v22 = vadd.f32 %v2451_v11, %v2306_v21  ;;  %v3466_v56 = vpop.f32.mrf.mxu1 }
 0x24e   :  { %v3516_v19 = vpop.f32.mrf.mxu0 }
 0x24f   :  { %2699 = vst.msk [vmem:[%s4957_s3 + $0xc] sm:$0xf] %vm2695_vm10, %v2924_v62  ;;  %v2573_v14 = vadd.f32 %v4803_v30, %v2541_v22  ;;  %v2227_v0 = vpop.f32.mrf.mxu1 }
 0x250   :  { %v2454_v6 = vpop.f32.mrf.mxu0  ;;  %v2309_v48 = vadd.f32 %v2227_v0, %v4747_v12 }
 0x251   :  { %v2925_v38 = vpack.c.bf16 %v2573_v14, %v2573_v14  ;;  %v2542_v43 = vadd.f32 %v2454_v6, %v2307_v16  ;;  %v3467_v15 = vpop.f32.mrf.mxu1 }
 0x252   :  { %v3517_v2 = vpop.f32.mrf.mxu0 }
 0x253   :  { %2700 = vst.msk [vmem:[%s4957_s3 + $0x10] sm:$0xf] %vm2695_vm10, %v2925_v38  ;;  %v2574_v3 = vadd.f32 %v4803_v30, %v2542_v43  ;;  %v2232_v45 = vpop.f32.mrf.mxu1 }
 0x254   :  { %v2459_v61 = vpop.f32.mrf.mxu0  ;;  %v2310_v33 = vadd.f32 %v2232_v45, %v4750_v44 }
 0x255   :  { %v2926_v37 = vpack.c.bf16 %v2574_v3, %v2574_v3  ;;  %v2543_v57 = vadd.f32 %v2459_v61, %v2308_v52  ;;  %v3470_v18 = vpop.f32.mrf.mxu1 }
 0x256   :  { %v3520_v55 = vpop.f32.mrf.mxu0 }
 0x257   :  { %2701 = vst.msk [vmem:[%s4957_s3 + $0x14] sm:$0xf] %vm2695_vm10, %v2926_v37  ;;  %v2575_v5 = vadd.f32 %v4803_v30, %v2543_v57  ;;  %v2235_v59 = vpop.f32.mrf.mxu1 }
 0x258   :  { %v2462_v17 = vpop.f32.mrf.mxu0  ;;  %v2311_v31 = vadd.f32 %v2235_v59, %v4753_v9 }
 0x259   :  { %v2927_v51 = vpack.c.bf16 %v2575_v5, %v2575_v5  ;;  %v2544_v20 = vadd.f32 %v2462_v17, %v2309_v48  ;;  %v3471_v24 = vpop.f32.mrf.mxu1 }
 0x25a   :  { %v3521_v8 = vpop.f32.mrf.mxu0 }
 0x25b   :  { %2702 = vst.msk [vmem:[%s4957_s3 + $0x18] sm:$0xf] %vm2695_vm10, %v2927_v51  ;;  %v2576_v12 = vadd.f32 %v4803_v30, %v2544_v20  ;;  %v2240_v54 = vpop.f32.mrf.mxu1 }
 0x25c   :  { %v2467_v32 = vpop.f32.mrf.mxu0  ;;  %v2312_v10 = vadd.f32 %v2240_v54, %v4756_v41 }
 0x25d   :  { %v2928_v34 = vpack.c.bf16 %v2576_v12, %v2576_v12  ;;  %v2545_v26 = vadd.f32 %v2467_v32, %v2310_v33  ;;  %v3474_v49 = vpop.f32.mrf.mxu1 }
 0x25e   :  { %v3524_v1 = vpop.f32.mrf.mxu0 }
 0x25f   :  { %2703 = vst.msk [vmem:[%s4957_s3 + $0x1c] sm:$0xf] %vm2695_vm10, %v2928_v34  ;;  %v2577_v44 = vadd.f32 %v4803_v30, %v2545_v26  ;;  %v2243_v39 = vpop.f32.mrf.mxu1 }
 0x260   :  { %v2470_v25 = vpop.f32.mrf.mxu0  ;;  %v2313_v16 = vadd.f32 %v2243_v39, %v4759_v53 }
 0x261   :  { %v2929_v50 = vpack.c.bf16 %v2577_v44, %v2577_v44  ;;  %v2546_v63 = vadd.f32 %v2470_v25, %v2311_v31  ;;  %v3475_v29 = vpop.f32.mrf.mxu1 }
 0x262   :  { %v3525_v21 = vpop.f32.mrf.mxu0 }
 0x263   :  { %2704 = vst.msk [vmem:[%s4957_s3 + $0x20] sm:$0xf] %vm2695_vm10, %v2929_v50  ;;  %v2578_v9 = vadd.f32 %v4803_v30, %v2546_v63  ;;  %v2248_v60 = vpop.f32.mrf.mxu1 }
 0x264   :  { %v2475_v11 = vpop.f32.mrf.mxu0  ;;  %v2314_v2 = vadd.f32 %v2248_v60, %v4762_v4 }
 0x265   :  { %v2930_v62 = vpack.c.bf16 %v2578_v9, %v2578_v9  ;;  %v2547_v22 = vadd.f32 %v2475_v11, %v2312_v10  ;;  %v3478_v14 = vpop.f32.mrf.mxu1 }
 0x266   :  { %v3528_v19 = vpop.f32.mrf.mxu0 }
 0x267   :  { %2705 = vst.msk [vmem:[%s4957_s3 + $0x24] sm:$0xf] %vm2695_vm10, %v2930_v62  ;;  %v2579_v41 = vadd.f32 %v4803_v30, %v2547_v22  ;;  %v2251_v38 = vpop.f32.mrf.mxu1 }
 0x268   :  { %v2478_v56 = vpop.f32.mrf.mxu0  ;;  %v2315_v57 = vadd.f32 %v2251_v38, %v4765_v27 }
 0x269   :  { %v2931_v6 = vpack.c.bf16 %v2579_v41, %v2579_v41  ;;  %v2548_v0 = vadd.f32 %v2478_v56, %v2313_v16  ;;  %v3479_v52 = vpop.f32.mrf.mxu1 }
 0x26a   :  { %v3529_v43 = vpop.f32.mrf.mxu0 }
 0x26b   :  { %2706 = vst.msk [vmem:[%s4957_s3 + $0x28] sm:$0xf] %vm2695_vm10, %v2931_v6  ;;  %v2580_v53 = vadd.f32 %v4803_v30, %v2548_v0  ;;  %v2256_v61 = vpop.f32.mrf.mxu1 }
 0x26c   :  { %v2483_v3 = vpop.f32.mrf.mxu0  ;;  %v2316_v59 = vadd.f32 %v2256_v61, %v4768_v42 }
 0x26d   :  { %v2932_v15 = vpack.c.bf16 %v2580_v53, %v2580_v53  ;;  %v2549_v37 = vadd.f32 %v2483_v3, %v2314_v2  ;;  %v3482_v55 = vpop.f32.mrf.mxu1 }
 0x26e   :  { %v3532_v45 = vpop.f32.mrf.mxu0 }
 0x26f   :  { %2707 = vst.msk [vmem:[%s4957_s3 + $0x2c] sm:$0xf] %vm2695_vm10, %v2932_v15  ;;  %v2581_v4 = vadd.f32 %v4803_v30, %v2549_v37  ;;  %v2259_v18 = vpop.f32.mrf.mxu1 }
 0x270   :  { %v2486_v48 = vpop.f32.mrf.mxu0  ;;  %v2317_v34 = vadd.f32 %v2259_v18, %v4771_v40 }
 0x271   :  { %v2933_v5 = vpack.c.bf16 %v2581_v4, %v2581_v4  ;;  %v2550_v17 = vadd.f32 %v2486_v48, %v2315_v57  ;;  %v3483_v20 = vpop.f32.mrf.mxu1 }
 0x272   :  { %v3533_v51 = vpop.f32.mrf.mxu0 }
 0x273   :  { %2708 = vst.msk [vmem:[%s4957_s3 + $0x30] sm:$0xf] %vm2695_vm10, %v2933_v5  ;;  %v2582_v27 = vadd.f32 %v4803_v30, %v2550_v17  ;;  %v2264_v12 = vpop.f32.mrf.mxu1 }
 0x274   :  { %v2491_v8 = vpop.f32.mrf.mxu0  ;;  %v2318_v25 = vadd.f32 %v2264_v12, %v4774_v35 }
 0x275   :  { %v2934_v33 = vpack.c.bf16 %v2582_v27, %v2582_v27  ;;  %v2551_v24 = vadd.f32 %v2491_v8, %v2316_v59  ;;  %v3486_v54 = vpop.f32.mrf.mxu1 }
 0x276   :  { %v3536_v32 = vpop.f32.mrf.mxu0 }
 0x277   :  { %2709 = vst.msk [vmem:[%s4957_s3 + $0x34] sm:$0xf] %vm2695_vm10, %v2934_v33  ;;  %v2583_v42 = vadd.f32 %v4803_v30, %v2551_v24  ;;  %v2267_v31 = vpop.f32.mrf.mxu1 }
 0x278   :  { %v2494_v26 = vpop.f32.mrf.mxu0  ;;  %v2319_v29 = vadd.f32 %v2267_v31, %v4777_v58 }
 0x279   :  { %v2935_v1 = vpack.c.bf16 %v2583_v42, %v2583_v42  ;;  %v2552_v44 = vadd.f32 %v2494_v26, %v2317_v34  ;;  %v3487_v50 = vpop.f32.mrf.mxu1 }
 0x27a   :  { %v3537_v49 = vpop.f32.mrf.mxu0 }
 0x27b   :  { %2710 = vst.msk [vmem:[%s4957_s3 + $0x38] sm:$0xf] %vm2695_vm10, %v2935_v1  ;;  %v2584_v40 = vadd.f32 %v4803_v30, %v2552_v44  ;;  %v2272_v21 = vpop.f32.mrf.mxu1 }
 0x27c   :  { %v2499_v39 = vpop.f32.mrf.mxu0  ;;  %v2320_v41 = vadd.f32 %v2272_v21, %v4780_v23 }
 0x27d   :  { %v2936_v63 = vpack.c.bf16 %v2584_v40, %v2584_v40  ;;  %v2553_v10 = vadd.f32 %v2499_v39, %v2318_v25  ;;  %v3490_v11 = vpop.f32.mrf.mxu1 }
 0x27e   :  { %v3540_v9 = vpop.f32.mrf.mxu0 }
 0x27f   :  { %2711 = vst.msk [vmem:[%s4957_s3 + $0x3c] sm:$0xf] %vm2695_vm10, %v2936_v63  ;;  %v2585_v35 = vadd.f32 %v4803_v30, %v2553_v10  ;;  %v2275_v22 = vpop.f32.mrf.mxu1 }
 0x280   :  { %v2502_v62 = vpop.f32.mrf.mxu0  ;;  %v2321_v2 = vadd.f32 %v2275_v22, %v4783_v13 }
 0x281   :  { %v2937_v60 = vpack.c.bf16 %v2585_v35, %v2585_v35  ;;  %v2554_v19 = vadd.f32 %v2502_v62, %v2319_v29  ;;  %v3491_v14 = vpop.f32.mrf.mxu1 }
 0x282   :  { %v3541_v16 = vpop.f32.mrf.mxu0 }
 0x283   :  { %2712 = vst.msk [vmem:[%s4957_s3 + $0x40] sm:$0xf] %vm2695_vm10, %v2937_v60  ;;  %v2586_v58 = vadd.f32 %v4803_v30, %v2554_v19  ;;  %v2280_v38 = vpop.f32.mrf.mxu1 }
 0x284   :  { %v2507_v56 = vpop.f32.mrf.mxu0  ;;  %v2322_v45 = vadd.f32 %v2280_v38, %v4786_v28 }
 0x285   :  { %v2938_v6 = vpack.c.bf16 %v2586_v58, %v2586_v58  ;;  %v2555_v0 = vadd.f32 %v2507_v56, %v2320_v41  ;;  %v3494_v53 = vpop.f32.mrf.mxu1 }
 0x286   :  { %v3544_v43 = vpop.f32.mrf.mxu0 }
 0x287   :  { %2713 = vst.msk [vmem:[%s4957_s3 + $0x44] sm:$0xf] %vm2695_vm10, %v2938_v6  ;;  %v2587_v23 = vadd.f32 %v4803_v30, %v2555_v0  ;;  %v2283_v15 = vpop.f32.mrf.mxu1 }
 0x288   :  { %v2510_v52 = vpop.f32.mrf.mxu0  ;;  %v2323_v17 = vadd.f32 %v2283_v15, %v4789_v36 }
 0x289   :  { %v2939_v3 = vpack.c.bf16 %v2587_v23, %v2587_v23  ;;  %v2556_v61 = vadd.f32 %v2510_v52, %v2321_v2  ;;  %v3495_v57 = vpop.f32.mrf.mxu1 }
 0x28a   :  { %v3545_v37 = vpop.f32.mrf.mxu0 }
 0x28b   :  { %2714 = vst.msk [vmem:[%s4957_s3 + $0x48] sm:$0xf] %vm2695_vm10, %v2939_v3  ;;  %v2588_v13 = vadd.f32 %v4803_v30, %v2556_v61  ;;  %v2288_v48 = vpop.f32.mrf.mxu1 }
 0x28c   :  { %v2515_v4 = vpop.f32.mrf.mxu0  ;;  %v2324_v12 = vadd.f32 %v2288_v48, %v4792_v7 }
 0x28d   :  { %v2940_v55 = vpack.c.bf16 %v2588_v13, %v2588_v13  ;;  %v2557_v5 = vadd.f32 %v2515_v4, %v2322_v45  ;;  %v3498_v51 = vpop.f32.mrf.mxu1 }
 0x28e   :  { %v3548_v18 = vpop.f32.mrf.mxu0 }
 0x28f   :  { %2715 = vst.msk [vmem:[%s4957_s3 + $0x4c] sm:$0xf] %vm2695_vm10, %v2940_v55  ;;  %v2589_v28 = vadd.f32 %v4803_v30, %v2557_v5  ;;  %v2291_v20 = vpop.f32.mrf.mxu1 }
 0x290   :  { %v2518_v59 = vpop.f32.mrf.mxu0  ;;  %v2325_v1 = vadd.f32 %v2291_v20, %v4795_v47 }
 0x291   :  { %v2941_v27 = vpack.c.bf16 %v2589_v28, %v2589_v28  ;;  %v2558_v8 = vadd.f32 %v2518_v59, %v2323_v17  ;;  %v3499_v24 = vpop.f32.mrf.mxu1 }
 0x292   :  { %v3549_v33 = vpop.f32.mrf.mxu0 }
 0x293   :  { %2716 = vst.msk [vmem:[%s4957_s3 + $0x50] sm:$0xf] %vm2695_vm10, %v2941_v27  ;;  %v2590_v36 = vadd.f32 %v4803_v30, %v2558_v8  ;;  %v2296_v42 = vpop.f32.mrf.mxu1 }
 0x294   :  { %v2523_v32 = vpop.f32.mrf.mxu0  ;;  %v2326_v39 = vadd.f32 %v2296_v42, %v4797_v46 }
 0x295   :  { %v2942_v34 = vpack.c.bf16 %v2590_v36, %v2590_v36  ;;  %v2559_v54 = vadd.f32 %v2523_v32, %v2324_v12  ;;  %v3502_v31 = vpop.f32.mrf.mxu1 }
 0x296   :  { %v3552_v26 = vpop.f32.mrf.mxu0 }
 0x297   :  { %2717 = vst.msk [vmem:[%s4957_s3 + $0x54] sm:$0xf] %vm2695_vm10, %v2942_v34  ;;  %v2591_v7 = vadd.f32 %v4803_v30, %v2559_v54  ;;  %v2299_v25 = vpop.f32.mrf.mxu1 }
 0x298   :  { %v2526_v44 = vpop.f32.mrf.mxu0 }
 0x299   :  { %v2943_v49 = vpack.c.bf16 %v2591_v7, %v2591_v7  ;;  %v2560_v40 = vadd.f32 %v2526_v44, %v2325_v1  ;;  %v3503_v63 = vpop.f32.mrf.mxu1 }
 0x29a   :  { %v3553_v50 = vpop.f32.mrf.mxu0 }
 0x29b   :  { %2718 = vst.msk [vmem:[%s4957_s3 + $0x58] sm:$0xf] %vm2695_vm10, %v2943_v49  ;;  %v2592_v47 = vadd.f32 %v4803_v30, %v2560_v40 }
 0x29c   :  { %v2531_v21 = vpop.f32.mrf.mxu0 }
 0x29d   :  { %v2944_v10 = vpack.c.bf16 %v2592_v47, %v2592_v47  ;;  %v2561_v9 = vadd.f32 %v2531_v21, %v2326_v39 }
 0x29e   :  { %v3556_v29 = vpop.f32.mrf.mxu0 }
 0x29f   :  { %2719 = vst.msk [vmem:[%s4957_s3 + $0x5c] sm:$0xf] %vm2695_vm10, %v2944_v10  ;;  %v2593_v35 = vadd.f32 %v4803_v30, %v2561_v9 }
 0x2a0   :  { %v2534_v46 = vpop.f32.mrf.mxu0 }
 0x2a1   :  { %v2945_v11 = vpack.c.bf16 %v2593_v35, %v2593_v35 }
 0x2a2   :  { %v3557_v62 = vpop.f32.mrf.mxu0 }
 0x2a3   :  { %2720 = vst.msk [vmem:[%s4957_s3 + $0x60] sm:$0xf] %vm2695_vm10, %v2945_v11 }

</bundles_post_ra>
